<compile_context>
chip_gen: v6e
topology: v6e:2x2x1
jax: 0.10.0
libtpu: 0.0.40
codegen_flags: <defaults>
</compile_context>

<pallas_src>
import functools

import jax
import jax.numpy as jnp
from jax.experimental import pallas as pl
from jax.experimental.pallas import tpu as pltpu

LN_EPS = 1e-5


def _round_up(n, m):
    return ((n + m - 1) // m) * m


def _fused_kernel(feat_ref, w1_ref, b1_ref, gamma_ref, beta_ref,
                  w2_ref, b2_ref, w3_ref, b3_ref,
                  out_ref, y_ref, *, ti, d_true, lane_dense):
    """Grid = (B, Tp//TI).

    y (= relu(LN(dense(features))) @ W2) is computed once per batch element
    into the VMEM scratch y_ref (linearity of dense2 over the subtraction).
    For i-tile i_blk:
      out[b, i_blk*TI + r, j, :] = out_proj(relu(y[j] - y[i_blk*TI + r] + b2))
    (column 0 of out_proj is a folded-in zero column.)
    """
    i_blk = pl.program_id(1)

    @pl.when(i_blk == 0)
    def _():
        # Stage 1: dense + layernorm + relu (dropout == identity in eval mode),
        # then fold dense2's weight in once per batch element:  y = x @ W2.
        x = jnp.dot(feat_ref[...], w1_ref[...], preferred_element_type=jnp.float32)
        x = x + b1_ref[...]                                    # (Tp, Dp)
        dp_ = x.shape[-1]
        lane_valid = jax.lax.broadcasted_iota(jnp.int32, (1, dp_), 1) < d_true
        inv_d = 1.0 / float(d_true)
        mean = jnp.sum(x, axis=-1, keepdims=True) * inv_d      # padded lanes are 0
        xc = jnp.where(lane_valid, x - mean, 0.0)
        var = jnp.sum(xc * xc, axis=-1, keepdims=True) * inv_d
        xn = xc * jax.lax.rsqrt(var + LN_EPS)
        xn = xn * gamma_ref[...] + beta_ref[...]               # pads have gamma=beta=0
        x = jnp.maximum(xn, 0.0)
        y_ref[...] = jnp.dot(x, w2_ref[...], preferred_element_type=jnp.float32)

    y_all = y_ref[...]                                         # (Tp, Dp) f32
    tp, dp = y_all.shape
    row0 = pl.multiple_of(i_blk * ti, ti)
    yi = y_ref[pl.ds(row0, ti), :]                             # (TI, Dp)

    # h[r, j, :] = relu(y[j] - y[i0 + r] + b2)   (dense2 already folded into y)
    h = jnp.maximum(y_all[None, :, :] - yi[:, None, :] + b2_ref[...], 0.0)
    h = h.reshape(ti * tp, dp).astype(jnp.bfloat16)            # big MXU M, bf16 operand

    # w3/b3 carry a zero column at index 0 -> logits[..., 0] == 0.0 exactly.
    logits = jnp.dot(h, w3_ref[...], preferred_element_type=jnp.float32) + b3_ref[...]

    o = logits.shape[-1]
    if lane_dense:
        out_ref[...] = logits.reshape(ti, tp * o)              # lane-dense (TI, Tp*O)
    else:
        out_ref[...] = logits.reshape(ti, tp, o)               # (TI, Tp, O)


def _vmem_budget_bytes():
    """~75% of per-core VMEM: ~96 MiB on v5e/v6e, ~48 MiB on v7x."""
    cap = None
    try:
        cap = int(pltpu.get_tpu_info().vmem_capacity_bytes)
    except Exception:
        cap = None
    if not cap or cap <= 0:
        cap = 64 * 1024 * 1024        # conservative default (v7x per-TC VMEM)
    return (cap * 3) // 4


def _pick_ti(tp, dp, d_in, o, budget_bytes, single_buf):
    """Largest TI (multiple of 8, dividing tp) whose working set fits the budget."""
    o_pad = _round_up(max(o, 1), 128)        # lane-padded VMEM footprint of O
    d_in_pad = _round_up(d_in, 128)
    wbuf = 1 if single_buf else 2            # buffer count for constant operands
    fixed = 4 * tp * dp                                   # y scratch (f32)
    fixed += 2 * 4 * tp * d_in_pad                        # features block (double-buffered)
    fixed += wbuf * 4 * _round_up(d_in, 8) * dp           # w1
    fixed += wbuf * 4 * 4 * 8 * dp                        # b1, gamma, beta, b2
    fixed += wbuf * 4 * dp * dp                           # w2
    fixed += wbuf * 2 * dp * o_pad                        # w3 (bf16)
    fixed += wbuf * 4 * 8 * o_pad                         # b3
    best = 8
    for ti in range(8, tp + 1, 8):
        if tp % ti:
            continue
        per = ti * tp * (4 * dp + 2 * dp)                 # h (f32) + h cast to bf16
        per += ti * tp * 4 * o_pad                        # logits (lane-padded worst case)
        per += 2 * ti * tp * 4 * o_pad                    # double-buffered out block
        if (fixed + per) * 1.15 <= budget_bytes:          # ~15% headroom
            best = ti
    return best


def _forward_padded(feat, w1, b1, gamma, beta, w2, b2, w3, b3,
                    *, d_true, lane_dense, single_buf, budget_bytes):
    B, Tp, D_in = feat.shape
    Dp = w2.shape[0]
    O = w3.shape[1]

    TI = _pick_ti(Tp, Dp, D_in, O, budget_bytes, single_buf)
    NI = Tp // TI

    def wspec(shape):
        idx = lambda b, i: (0,) * len(shape)
        if single_buf:
            # Constant index maps -> no point double-buffering these blocks.
            return pl.BlockSpec(shape, idx, pipeline_mode=pl.Buffered(1))
        return pl.BlockSpec(shape, idx)

    in_specs = [
        pl.BlockSpec((None, Tp, D_in), lambda b, i: (b, 0, 0)),   # features[b]
        wspec((D_in, Dp)),                                        # w1
        wspec((1, Dp)),                                           # b1
        wspec((1, Dp)),                                           # gamma
        wspec((1, Dp)),                                           # beta
        wspec((Dp, Dp)),                                          # w2
        wspec((1, Dp)),                                           # b2
        wspec((Dp, O)),                                           # w3 (bf16, zero col folded)
        wspec((1, O)),                                            # b3 (zero col folded)
    ]

    if lane_dense:
        out_shape = jax.ShapeDtypeStruct((B, Tp, Tp * O), jnp.float32)
        out_spec = pl.BlockSpec((None, TI, Tp * O), lambda b, i: (b, i, 0))
    else:
        out_shape = jax.ShapeDtypeStruct((B, Tp, Tp, O), jnp.float32)
        out_spec = pl.BlockSpec((None, TI, Tp, O), lambda b, i: (b, i, 0, 0))

    kernel = functools.partial(_fused_kernel, ti=TI, d_true=d_true,
                               lane_dense=lane_dense)

    out = pl.pallas_call(
        kernel,
        out_shape=out_shape,
        grid=(B, NI),
        in_specs=in_specs,
        out_specs=out_spec,
        scratch_shapes=[pltpu.VMEM((Tp, Dp), jnp.float32)],   # y, lives across i-tiles
        compiler_params=pltpu.CompilerParams(
            dimension_semantics=("parallel", "arbitrary"),
            vmem_limit_bytes=int(budget_bytes),
        ),
    )(feat, w1, b1, gamma, beta, w2, b2, w3, b3)

    # Block inside this helper so lowering/runtime failures surface here and the
    # caller's fallback ladder can retry with a safer configuration.
    out = jax.block_until_ready(out)
    if lane_dense:
        out = out.reshape(B, Tp, Tp, O)
    return out


def chart_parser_head(features, params):
    B, T, D_in = features.shape
    w1, b1 = params["w1"], params["b1"]
    gamma, beta = params["gamma"], params["beta"]
    w2, b2 = params["w2"], params["b2"]
    w3, b3 = params["w3"], params["b3"]
    D = w1.shape[1]                      # inner_dim == in_features
    O = w3.shape[1] + 1                  # out_features (incl. the zero column)

    # Glue: fold the "cat zero column" into the out_proj weights.
    w3p = jnp.pad(w3, ((0, 0), (1, 0)))  # (D, O)
    b3p = jnp.pad(b3, ((0, 0), (1, 0)))  # (1, O)

    # Zero-pad inner dim D up to a lane multiple (128); LN uses true D via mask.
    Dp = _round_up(max(D, 128), 128)
    pd = Dp - D
    if pd:
        w1 = jnp.pad(w1, ((0, 0), (0, pd)))
        b1 = jnp.pad(b1, ((0, 0), (0, pd)))
        gamma = jnp.pad(gamma, ((0, 0), (0, pd)))   # pad gamma/beta with 0 -> pads stay 0
        beta = jnp.pad(beta, ((0, 0), (0, pd)))
        w2 = jnp.pad(w2, ((0, pd), (0, pd)))
        b2 = jnp.pad(b2, ((0, 0), (0, pd)))
        w3p = jnp.pad(w3p, ((0, pd), (0, 0)))
    w3p = w3p.astype(jnp.bfloat16)       # bf16 MXU operand (zero column stays exactly 0)

    # Pad T to a sublane multiple so in-kernel leading-dim reshapes are free.
    Tp = _round_up(T, 8)
    feat = features if Tp == T else jnp.pad(features, ((0, 0), (0, Tp - T), (0, 0)))

    budget = _vmem_budget_bytes()
    args = (feat, w1, b1, gamma, beta, w2, b2, w3p, b3p)

    # Most-optimized config first; fall back if this Mosaic version rejects the
    # lane-dense shapecast, Buffered(1), or the raised VMEM limit.  The last
    # entry is the known-safe layout / limit.
    configs = [
        dict(lane_dense=True, single_buf=True, budget_bytes=budget),
        dict(lane_dense=False, single_buf=True, budget_bytes=budget),
        dict(lane_dense=True, single_buf=False, budget_bytes=budget),
        dict(lane_dense=False, single_buf=False, budget_bytes=budget),
        dict(lane_dense=False, single_buf=False, budget_bytes=32 * 1024 * 1024),
    ]
    out, last_err = None, None
    for cfg in configs:
        try:
            out = _forward_padded(*args, d_true=D, **cfg)
            break
        except Exception as err:          # lowering/compile fallback
            last_err = err
    if out is None:
        raise last_err

    if Tp != T:
        out = out[:, :T, :T, :]
    return out


def reference(features, params):
    """Pure-JAX reference mirroring the PyTorch forward (eval mode), f32."""
    x = features @ params["w1"] + params["b1"]
    mean = x.mean(-1, keepdims=True)
    var = ((x - mean) ** 2).mean(-1, keepdims=True)
    x = (x - mean) / jnp.sqrt(var + LN_EPS) * params["gamma"] + params["beta"]
    x = jnp.maximum(x, 0.0)
    d = x[:, None, :, :] - x[:, :, None, :]          # d[b,i,j,:] = x[b,j]-x[b,i]
    h = jnp.maximum(d @ params["w2"] + params["b2"], 0.0)
    logits = h @ params["w3"] + params["b3"]
    B, T = features.shape[:2]
    zeros = jnp.zeros((B, T, T, 1), logits.dtype)
    return jnp.concatenate([zeros, logits], axis=-1)


if __name__ == "__main__":
    B, T = 2, 8
    in_features = 32          # in_features == inner_dim
    out_features = 16
    D = in_features

    key = jax.random.PRNGKey(0)
    ks = jax.random.split(key, 9)
    s = 0.1
    params = {
        "w1": s * jax.random.normal(ks[0], (in_features, D), jnp.float32),
        "b1": s * jax.random.normal(ks[1], (1, D), jnp.float32),
        "gamma": 1.0 + s * jax.random.normal(ks[2], (1, D), jnp.float32),
        "beta": s * jax.random.normal(ks[3], (1, D), jnp.float32),
        "w2": s * jax.random.normal(ks[4], (D, D), jnp.float32),
        "b2": s * jax.random.normal(ks[5], (1, D), jnp.float32),
        "w3": s * jax.random.normal(ks[6], (D, out_features - 1), jnp.float32),
        "b3": s * jax.random.normal(ks[7], (1, out_features - 1), jnp.float32),
    }
    features = jax.random.normal(ks[8], (B, T, in_features), jnp.float32)

    out = chart_parser_head(features, params)
    out = jax.block_until_ready(out)

    ref = reference(features, params)
    assert out.shape == (B, T, T, out_features), out.shape
    assert jnp.allclose(out[..., 0], 0.0)
    # Tolerance accounts for bf16 MXU operands in the out_proj matmul.
    err = float(jnp.max(jnp.abs(out - ref)))
    assert jnp.allclose(out, ref, atol=1e-2, rtol=1e-2), err
    print("KERNEL_OK")
</pallas_src>

<mosaic_0001>
module attributes {stable_mosaic.version = 11 : i64} {
  func.func @_fused_kernel(%arg0: i32, %arg1: i32, %arg2: memref<1x8x32xf32, #tpu.memory_space<vmem>>, %arg3: memref<32x128xf32, #tpu.memory_space<vmem>>, %arg4: memref<1x128xf32, #tpu.memory_space<vmem>>, %arg5: memref<1x128xf32, #tpu.memory_space<vmem>>, %arg6: memref<1x128xf32, #tpu.memory_space<vmem>>, %arg7: memref<128x128xf32, #tpu.memory_space<vmem>>, %arg8: memref<1x128xf32, #tpu.memory_space<vmem>>, %arg9: memref<128x16xbf16, #tpu.memory_space<vmem>>, %arg10: memref<1x16xf32, #tpu.memory_space<vmem>>, %arg11: memref<1x8x128xf32, #tpu.memory_space<vmem>>, %arg12: memref<8x128xf32, #tpu.memory_space<vmem>>) attributes {dimension_semantics = [#tpu.dimension_semantics<parallel>, #tpu.dimension_semantics<arbitrary>], iteration_bounds = array<i64: 2, 1>, scalar_prefetch = 0 : i64, scratch_operands = 1 : i64, tpu.core_type = #tpu.core_type<tc>, window_params = [{transform_indices = @transform_0, window_bounds = array<i64: 1, 8, 32>}, {pipeline_mode = #tpu.pipeline_mode<synchronous>, transform_indices = @transform_1, window_bounds = array<i64: 32, 128>}, {pipeline_mode = #tpu.pipeline_mode<synchronous>, transform_indices = @transform_2, window_bounds = array<i64: 1, 128>}, {pipeline_mode = #tpu.pipeline_mode<synchronous>, transform_indices = @transform_3, window_bounds = array<i64: 1, 128>}, {pipeline_mode = #tpu.pipeline_mode<synchronous>, transform_indices = @transform_4, window_bounds = array<i64: 1, 128>}, {pipeline_mode = #tpu.pipeline_mode<synchronous>, transform_indices = @transform_5, window_bounds = array<i64: 128, 128>}, {pipeline_mode = #tpu.pipeline_mode<synchronous>, transform_indices = @transform_6, window_bounds = array<i64: 1, 128>}, {pipeline_mode = #tpu.pipeline_mode<synchronous>, transform_indices = @transform_7, window_bounds = array<i64: 128, 16>}, {pipeline_mode = #tpu.pipeline_mode<synchronous>, transform_indices = @transform_8, window_bounds = array<i64: 1, 16>}, {transform_indices = @transform_9, window_bounds = array<i64: 1, 8, 128>}]} {
    %c0_i32 = arith.constant 0 : i32
    %0 = arith.cmpi eq, %arg1, %c0_i32 : i32
    %1 = arith.extui %0 : i1 to i32
    %c0_i32_0 = arith.constant 0 : i32
    %2 = arith.cmpi ne, %1, %c0_i32_0 : i32
    scf.if %2 {
      %c0_13 = arith.constant 0 : index
      %c0_14 = arith.constant 0 : index
      %c0_15 = arith.constant 0 : index
      %30 = vector.load %arg2[%c0_13, %c0_14, %c0_15] : memref<1x8x32xf32, #tpu.memory_space<vmem>>, vector<1x8x32xf32>
      %31 = vector.shape_cast %30 : vector<1x8x32xf32> to vector<8x32xf32>
      %c0_16 = arith.constant 0 : index
      %c0_17 = arith.constant 0 : index
      %32 = vector.load %arg3[%c0_16, %c0_17] : memref<32x128xf32, #tpu.memory_space<vmem>>, vector<32x128xf32>
      %cst_18 = arith.constant dense<0.000000e+00> : vector<8x128xf32>
      %33 = tpu.matmul %31, %32, %cst_18 {dimension_numbers = #tpu.dot_dimension_numbers<[1], [0], [0], [1], [0, 0, 1, 1], [], []>} : vector<8x32xf32>, vector<32x128xf32>, vector<8x128xf32> -> vector<8x128xf32>
      %c0_19 = arith.constant 0 : index
      %c0_20 = arith.constant 0 : index
      %34 = vector.load %arg4[%c0_19, %c0_20] : memref<1x128xf32, #tpu.memory_space<vmem>>, vector<1x128xf32>
      %35 = vector.broadcast %34 : vector<1x128xf32> to vector<8x128xf32>
      %36 = arith.addf %33, %35 : vector<8x128xf32>
      %37 = tpu.iota {dimensions = array<i32: 1>} : vector<1x128xi32>
      %c32_i32 = arith.constant 32 : i32
      %38 = vector.broadcast %c32_i32 : i32 to vector<1x128xi32>
      %39 = arith.cmpi slt, %37, %38 : vector<1x128xi32>
      %cst_21 = arith.constant dense<0.000000e+00> : vector<8xf32>
      %40 = vector.multi_reduction <add>, %36, %cst_21 [1] : vector<8x128xf32> to vector<8xf32>
      %41 = vector.shape_cast %40 : vector<8xf32> to vector<8x1xf32>
      %cst_22 = arith.constant 3.125000e-02 : f32
      %42 = vector.broadcast %cst_22 : f32 to vector<8x1xf32>
      %43 = arith.mulf %41, %42 : vector<8x1xf32>
      %44 = vector.broadcast %43 : vector<8x1xf32> to vector<8x128xf32>
      %45 = arith.subf %36, %44 : vector<8x128xf32>
      %cst_23 = arith.constant 0.000000e+00 : f32
      %46 = vector.shape_cast %39 : vector<1x128xi1> to vector<1x128xi1>
      %47 = vector.broadcast %46 : vector<1x128xi1> to vector<8x128xi1>
      %48 = vector.broadcast %cst_23 : f32 to vector<8x128xf32>
      %49 = arith.select %47, %45, %48 : vector<8x128xi1>, vector<8x128xf32>
      %50 = arith.mulf %49, %49 : vector<8x128xf32>
      %cst_24 = arith.constant dense<0.000000e+00> : vector<8xf32>
      %51 = vector.multi_reduction <add>, %50, %cst_24 [1] : vector<8x128xf32> to vector<8xf32>
      %52 = vector.shape_cast %51 : vector<8xf32> to vector<8x1xf32>
      %cst_25 = arith.constant 3.125000e-02 : f32
      %53 = vector.broadcast %cst_25 : f32 to vector<8x1xf32>
      %54 = arith.mulf %52, %53 : vector<8x1xf32>
      %cst_26 = arith.constant 9.99999974E-6 : f32
      %55 = vector.broadcast %cst_26 : f32 to vector<8x1xf32>
      %56 = arith.addf %54, %55 : vector<8x1xf32>
      %57 = math.rsqrt %56 : vector<8x1xf32>
      %58 = vector.broadcast %57 : vector<8x1xf32> to vector<8x128xf32>
      %59 = arith.mulf %49, %58 : vector<8x128xf32>
      %c0_27 = arith.constant 0 : index
      %c0_28 = arith.constant 0 : index
      %60 = vector.load %arg5[%c0_27, %c0_28] : memref<1x128xf32, #tpu.memory_space<vmem>>, vector<1x128xf32>
      %61 = vector.broadcast %60 : vector<1x128xf32> to vector<8x128xf32>
      %62 = arith.mulf %59, %61 : vector<8x128xf32>
      %c0_29 = arith.constant 0 : index
      %c0_30 = arith.constant 0 : index
      %63 = vector.load %arg6[%c0_29, %c0_30] : memref<1x128xf32, #tpu.memory_space<vmem>>, vector<1x128xf32>
      %64 = vector.broadcast %63 : vector<1x128xf32> to vector<8x128xf32>
      %65 = arith.addf %62, %64 : vector<8x128xf32>
      %cst_31 = arith.constant 0.000000e+00 : f32
      %66 = vector.broadcast %cst_31 : f32 to vector<8x128xf32>
      %67 = arith.maximumf %65, %66 : vector<8x128xf32>
      %c0_32 = arith.constant 0 : index
      %c0_33 = arith.constant 0 : index
      %68 = vector.load %arg7[%c0_32, %c0_33] : memref<128x128xf32, #tpu.memory_space<vmem>>, vector<128x128xf32>
      %cst_34 = arith.constant dense<0.000000e+00> : vector<8x128xf32>
      %69 = tpu.matmul %67, %68, %cst_34 {dimension_numbers = #tpu.dot_dimension_numbers<[1], [0], [0], [1], [0, 0, 1, 1], [], []>} : vector<8x128xf32>, vector<128x128xf32>, vector<8x128xf32> -> vector<8x128xf32>
      %c0_35 = arith.constant 0 : index
      %c0_36 = arith.constant 0 : index
      %70 = vector.load %arg12[%c0_35, %c0_36] : memref<8x128xf32, #tpu.memory_space<vmem>>, vector<8x128xf32>
      tpu.vector_store %arg12[%c0_35, %c0_36], %69 {strides = array<i32>} : memref<8x128xf32, #tpu.memory_space<vmem>>, vector<8x128xf32>,
    } else {
    }
    %c0 = arith.constant 0 : index
    %c0_1 = arith.constant 0 : index
    %3 = vector.load %arg12[%c0, %c0_1] : memref<8x128xf32, #tpu.memory_space<vmem>>, vector<8x128xf32>
    %c8_i32 = arith.constant 8 : i32
    %4 = arith.muli %arg1, %c8_i32 : i32
    %5 = tpu.assume_multiple %4, 8 : i32
    %6 = arith.index_cast %5 : i32 to index
    %c0_2 = arith.constant 0 : index
    %7 = vector.load %arg12[%6, %c0_2] : memref<8x128xf32, #tpu.memory_space<vmem>>, vector<8x128xf32>
    %8 = vector.shape_cast %3 : vector<8x128xf32> to vector<1x8x128xf32>
    %9 = vector.shape_cast %7 : vector<8x128xf32> to vector<8x1x128xf32>
    %10 = vector.broadcast %8 : vector<1x8x128xf32> to vector<8x8x128xf32>
    %11 = vector.broadcast %9 : vector<8x1x128xf32> to vector<8x8x128xf32>
    %12 = arith.subf %10, %11 : vector<8x8x128xf32>
    %c0_3 = arith.constant 0 : index
    %c0_4 = arith.constant 0 : index
    %13 = vector.load %arg8[%c0_3, %c0_4] : memref<1x128xf32, #tpu.memory_space<vmem>>, vector<1x128xf32>
    %14 = vector.shape_cast %13 : vector<1x128xf32> to vector<1x1x128xf32>
    %15 = vector.broadcast %14 : vector<1x1x128xf32> to vector<8x8x128xf32>
    %16 = arith.addf %12, %15 : vector<8x8x128xf32>
    %cst = arith.constant 0.000000e+00 : f32
    %17 = vector.broadcast %cst : f32 to vector<8x8x128xf32>
    %18 = arith.maximumf %16, %17 : vector<8x8x128xf32>
    %19 = vector.shape_cast %18 : vector<8x8x128xf32> to vector<64x128xf32>
    %20 = arith.truncf %19 : vector<64x128xf32> to vector<64x128xbf16>
    %c0_5 = arith.constant 0 : index
    %c0_6 = arith.constant 0 : index
    %21 = vector.load %arg9[%c0_5, %c0_6] : memref<128x16xbf16, #tpu.memory_space<vmem>>, vector<128x16xbf16>
    %cst_7 = arith.constant dense<0.000000e+00> : vector<64x16xf32>
    %22 = tpu.matmul %20, %21, %cst_7 {dimension_numbers = #tpu.dot_dimension_numbers<[1], [0], [0], [1], [0, 0, 1, 1], [], []>} : vector<64x128xbf16>, vector<128x16xbf16>, vector<64x16xf32> -> vector<64x16xf32>
    %c0_8 = arith.constant 0 : index
    %c0_9 = arith.constant 0 : index
    %23 = vector.load %arg10[%c0_8, %c0_9] : memref<1x16xf32, #tpu.memory_space<vmem>>, vector<1x16xf32>
    %24 = vector.broadcast %23 : vector<1x16xf32> to vector<64x16xf32>
    %25 = arith.addf %22, %24 : vector<64x16xf32>
    %26 = vector.shape_cast %25 : vector<64x16xf32> to vector<8x128xf32>
    %c0_10 = arith.constant 0 : index
    %c0_11 = arith.constant 0 : index
    %c0_12 = arith.constant 0 : index
    %27 = vector.load %arg11[%c0_10, %c0_11, %c0_12] : memref<1x8x128xf32, #tpu.memory_space<vmem>>, vector<1x8x128xf32>
    %28 = vector.shape_cast %27 : vector<1x8x128xf32> to vector<8x128xf32>
    %29 = vector.shape_cast %26 : vector<8x128xf32> to vector<1x8x128xf32>
    tpu.vector_store %arg11[%c0_10, %c0_11, %c0_12], %29 {strides = array<i32>} : memref<1x8x128xf32, #tpu.memory_space<vmem>>, vector<1x8x128xf32>,
    return
  }
  func.func @transform_0(%arg0: i32, %arg1: i32) -> (i32, i32, i32) {
    %c0_i32 = arith.constant 0 : i32
    %c0_i32_0 = arith.constant 0 : i32
    %c0_i32_1 = arith.constant 0 : i32
    return %arg0, %c0_i32, %c0_i32_0 : i32, i32, i32
  }
  func.func @transform_1(%arg0: i32, %arg1: i32) -> (i32, i32) {
    %c0_i32 = arith.constant 0 : i32
    %c0_i32_0 = arith.constant 0 : i32
    %c0_i32_1 = arith.constant 0 : i32
    return %c0_i32, %c0_i32_0 : i32, i32
  }
  func.func @transform_2(%arg0: i32, %arg1: i32) -> (i32, i32) {
    %c0_i32 = arith.constant 0 : i32
    %c0_i32_0 = arith.constant 0 : i32
    %c0_i32_1 = arith.constant 0 : i32
    return %c0_i32, %c0_i32_0 : i32, i32
  }
  func.func @transform_3(%arg0: i32, %arg1: i32) -> (i32, i32) {
    %c0_i32 = arith.constant 0 : i32
    %c0_i32_0 = arith.constant 0 : i32
    %c0_i32_1 = arith.constant 0 : i32
    return %c0_i32, %c0_i32_0 : i32, i32
  }
  func.func @transform_4(%arg0: i32, %arg1: i32) -> (i32, i32) {
    %c0_i32 = arith.constant 0 : i32
    %c0_i32_0 = arith.constant 0 : i32
    %c0_i32_1 = arith.constant 0 : i32
    return %c0_i32, %c0_i32_0 : i32, i32
  }
  func.func @transform_5(%arg0: i32, %arg1: i32) -> (i32, i32) {
    %c0_i32 = arith.constant 0 : i32
    %c0_i32_0 = arith.constant 0 : i32
    %c0_i32_1 = arith.constant 0 : i32
    return %c0_i32, %c0_i32_0 : i32, i32
  }
  func.func @transform_6(%arg0: i32, %arg1: i32) -> (i32, i32) {
    %c0_i32 = arith.constant 0 : i32
    %c0_i32_0 = arith.constant 0 : i32
    %c0_i32_1 = arith.constant 0 : i32
    return %c0_i32, %c0_i32_0 : i32, i32
  }
  func.func @transform_7(%arg0: i32, %arg1: i32) -> (i32, i32) {
    %c0_i32 = arith.constant 0 : i32
    %c0_i32_0 = arith.constant 0 : i32
    %c0_i32_1 = arith.constant 0 : i32
    return %c0_i32, %c0_i32_0 : i32, i32
  }
  func.func @transform_8(%arg0: i32, %arg1: i32) -> (i32, i32) {
    %c0_i32 = arith.constant 0 : i32
    %c0_i32_0 = arith.constant 0 : i32
    %c0_i32_1 = arith.constant 0 : i32
    return %c0_i32, %c0_i32_0 : i32, i32
  }
  func.func @transform_9(%arg0: i32, %arg1: i32) -> (i32, i32, i32) {
    %c0_i32 = arith.constant 0 : i32
    %c0_i32_0 = arith.constant 0 : i32
    return %arg0, %arg1, %c0_i32 : i32, i32, i32
  }
}

module attributes {stable_mosaic.version = 11 : i64} {
  func.func @_fused_kernel(%arg0: i32, %arg1: i32, %arg2: memref<1x8x32xf32, #tpu.memory_space<vmem>>, %arg3: memref<32x128xf32, #tpu.memory_space<vmem>>, %arg4: memref<1x128xf32, #tpu.memory_space<vmem>>, %arg5: memref<1x128xf32, #tpu.memory_space<vmem>>, %arg6: memref<1x128xf32, #tpu.memory_space<vmem>>, %arg7: memref<128x128xf32, #tpu.memory_space<vmem>>, %arg8: memref<1x128xf32, #tpu.memory_space<vmem>>, %arg9: memref<128x16xbf16, #tpu.memory_space<vmem>>, %arg10: memref<1x16xf32, #tpu.memory_space<vmem>>, %arg11: memref<1x8x8x16xf32, #tpu.memory_space<vmem>>, %arg12: memref<8x128xf32, #tpu.memory_space<vmem>>) attributes {dimension_semantics = [#tpu.dimension_semantics<parallel>, #tpu.dimension_semantics<arbitrary>], iteration_bounds = array<i64: 2, 1>, scalar_prefetch = 0 : i64, scratch_operands = 1 : i64, tpu.core_type = #tpu.core_type<tc>, window_params = [{transform_indices = @transform_0, window_bounds = array<i64: 1, 8, 32>}, {pipeline_mode = #tpu.pipeline_mode<synchronous>, transform_indices = @transform_1, window_bounds = array<i64: 32, 128>}, {pipeline_mode = #tpu.pipeline_mode<synchronous>, transform_indices = @transform_2, window_bounds = array<i64: 1, 128>}, {pipeline_mode = #tpu.pipeline_mode<synchronous>, transform_indices = @transform_3, window_bounds = array<i64: 1, 128>}, {pipeline_mode = #tpu.pipeline_mode<synchronous>, transform_indices = @transform_4, window_bounds = array<i64: 1, 128>}, {pipeline_mode = #tpu.pipeline_mode<synchronous>, transform_indices = @transform_5, window_bounds = array<i64: 128, 128>}, {pipeline_mode = #tpu.pipeline_mode<synchronous>, transform_indices = @transform_6, window_bounds = array<i64: 1, 128>}, {pipeline_mode = #tpu.pipeline_mode<synchronous>, transform_indices = @transform_7, window_bounds = array<i64: 128, 16>}, {pipeline_mode = #tpu.pipeline_mode<synchronous>, transform_indices = @transform_8, window_bounds = array<i64: 1, 16>}, {transform_indices = @transform_9, window_bounds = array<i64: 1, 8, 8, 16>}]} {
    %c0_i32 = arith.constant 0 : i32
    %0 = arith.cmpi eq, %arg1, %c0_i32 : i32
    %1 = arith.extui %0 : i1 to i32
    %c0_i32_0 = arith.constant 0 : i32
    %2 = arith.cmpi ne, %1, %c0_i32_0 : i32
    scf.if %2 {
      %c0_14 = arith.constant 0 : index
      %c0_15 = arith.constant 0 : index
      %c0_16 = arith.constant 0 : index
      %30 = vector.load %arg2[%c0_14, %c0_15, %c0_16] : memref<1x8x32xf32, #tpu.memory_space<vmem>>, vector<1x8x32xf32>
      %31 = vector.shape_cast %30 : vector<1x8x32xf32> to vector<8x32xf32>
      %c0_17 = arith.constant 0 : index
      %c0_18 = arith.constant 0 : index
      %32 = vector.load %arg3[%c0_17, %c0_18] : memref<32x128xf32, #tpu.memory_space<vmem>>, vector<32x128xf32>
      %cst_19 = arith.constant dense<0.000000e+00> : vector<8x128xf32>
      %33 = tpu.matmul %31, %32, %cst_19 {dimension_numbers = #tpu.dot_dimension_numbers<[1], [0], [0], [1], [0, 0, 1, 1], [], []>} : vector<8x32xf32>, vector<32x128xf32>, vector<8x128xf32> -> vector<8x128xf32>
      %c0_20 = arith.constant 0 : index
      %c0_21 = arith.constant 0 : index
      %34 = vector.load %arg4[%c0_20, %c0_21] : memref<1x128xf32, #tpu.memory_space<vmem>>, vector<1x128xf32>
      %35 = vector.broadcast %34 : vector<1x128xf32> to vector<8x128xf32>
      %36 = arith.addf %33, %35 : vector<8x128xf32>
      %37 = tpu.iota {dimensions = array<i32: 1>} : vector<1x128xi32>
      %c32_i32 = arith.constant 32 : i32
      %38 = vector.broadcast %c32_i32 : i32 to vector<1x128xi32>
      %39 = arith.cmpi slt, %37, %38 : vector<1x128xi32>
      %cst_22 = arith.constant dense<0.000000e+00> : vector<8xf32>
      %40 = vector.multi_reduction <add>, %36, %cst_22 [1] : vector<8x128xf32> to vector<8xf32>
      %41 = vector.shape_cast %40 : vector<8xf32> to vector<8x1xf32>
      %cst_23 = arith.constant 3.125000e-02 : f32
      %42 = vector.broadcast %cst_23 : f32 to vector<8x1xf32>
      %43 = arith.mulf %41, %42 : vector<8x1xf32>
      %44 = vector.broadcast %43 : vector<8x1xf32> to vector<8x128xf32>
      %45 = arith.subf %36, %44 : vector<8x128xf32>
      %cst_24 = arith.constant 0.000000e+00 : f32
      %46 = vector.shape_cast %39 : vector<1x128xi1> to vector<1x128xi1>
      %47 = vector.broadcast %46 : vector<1x128xi1> to vector<8x128xi1>
      %48 = vector.broadcast %cst_24 : f32 to vector<8x128xf32>
      %49 = arith.select %47, %45, %48 : vector<8x128xi1>, vector<8x128xf32>
      %50 = arith.mulf %49, %49 : vector<8x128xf32>
      %cst_25 = arith.constant dense<0.000000e+00> : vector<8xf32>
      %51 = vector.multi_reduction <add>, %50, %cst_25 [1] : vector<8x128xf32> to vector<8xf32>
      %52 = vector.shape_cast %51 : vector<8xf32> to vector<8x1xf32>
      %cst_26 = arith.constant 3.125000e-02 : f32
      %53 = vector.broadcast %cst_26 : f32 to vector<8x1xf32>
      %54 = arith.mulf %52, %53 : vector<8x1xf32>
      %cst_27 = arith.constant 9.99999974E-6 : f32
      %55 = vector.broadcast %cst_27 : f32 to vector<8x1xf32>
      %56 = arith.addf %54, %55 : vector<8x1xf32>
      %57 = math.rsqrt %56 : vector<8x1xf32>
      %58 = vector.broadcast %57 : vector<8x1xf32> to vector<8x128xf32>
      %59 = arith.mulf %49, %58 : vector<8x128xf32>
      %c0_28 = arith.constant 0 : index
      %c0_29 = arith.constant 0 : index
      %60 = vector.load %arg5[%c0_28, %c0_29] : memref<1x128xf32, #tpu.memory_space<vmem>>, vector<1x128xf32>
      %61 = vector.broadcast %60 : vector<1x128xf32> to vector<8x128xf32>
      %62 = arith.mulf %59, %61 : vector<8x128xf32>
      %c0_30 = arith.constant 0 : index
      %c0_31 = arith.constant 0 : index
      %63 = vector.load %arg6[%c0_30, %c0_31] : memref<1x128xf32, #tpu.memory_space<vmem>>, vector<1x128xf32>
      %64 = vector.broadcast %63 : vector<1x128xf32> to vector<8x128xf32>
      %65 = arith.addf %62, %64 : vector<8x128xf32>
      %cst_32 = arith.constant 0.000000e+00 : f32
      %66 = vector.broadcast %cst_32 : f32 to vector<8x128xf32>
      %67 = arith.maximumf %65, %66 : vector<8x128xf32>
      %c0_33 = arith.constant 0 : index
      %c0_34 = arith.constant 0 : index
      %68 = vector.load %arg7[%c0_33, %c0_34] : memref<128x128xf32, #tpu.memory_space<vmem>>, vector<128x128xf32>
      %cst_35 = arith.constant dense<0.000000e+00> : vector<8x128xf32>
      %69 = tpu.matmul %67, %68, %cst_35 {dimension_numbers = #tpu.dot_dimension_numbers<[1], [0], [0], [1], [0, 0, 1, 1], [], []>} : vector<8x128xf32>, vector<128x128xf32>, vector<8x128xf32> -> vector<8x128xf32>
      %c0_36 = arith.constant 0 : index
      %c0_37 = arith.constant 0 : index
      %70 = vector.load %arg12[%c0_36, %c0_37] : memref<8x128xf32, #tpu.memory_space<vmem>>, vector<8x128xf32>
      tpu.vector_store %arg12[%c0_36, %c0_37], %69 {strides = array<i32>} : memref<8x128xf32, #tpu.memory_space<vmem>>, vector<8x128xf32>,
    } else {
    }
    %c0 = arith.constant 0 : index
    %c0_1 = arith.constant 0 : index
    %3 = vector.load %arg12[%c0, %c0_1] : memref<8x128xf32, #tpu.memory_space<vmem>>, vector<8x128xf32>
    %c8_i32 = arith.constant 8 : i32
    %4 = arith.muli %arg1, %c8_i32 : i32
    %5 = tpu.assume_multiple %4, 8 : i32
    %6 = arith.index_cast %5 : i32 to index
    %c0_2 = arith.constant 0 : index
    %7 = vector.load %arg12[%6, %c0_2] : memref<8x128xf32, #tpu.memory_space<vmem>>, vector<8x128xf32>
    %8 = vector.shape_cast %3 : vector<8x128xf32> to vector<1x8x128xf32>
    %9 = vector.shape_cast %7 : vector<8x128xf32> to vector<8x1x128xf32>
    %10 = vector.broadcast %8 : vector<1x8x128xf32> to vector<8x8x128xf32>
    %11 = vector.broadcast %9 : vector<8x1x128xf32> to vector<8x8x128xf32>
    %12 = arith.subf %10, %11 : vector<8x8x128xf32>
    %c0_3 = arith.constant 0 : index
    %c0_4 = arith.constant 0 : index
    %13 = vector.load %arg8[%c0_3, %c0_4] : memref<1x128xf32, #tpu.memory_space<vmem>>, vector<1x128xf32>
    %14 = vector.shape_cast %13 : vector<1x128xf32> to vector<1x1x128xf32>
    %15 = vector.broadcast %14 : vector<1x1x128xf32> to vector<8x8x128xf32>
    %16 = arith.addf %12, %15 : vector<8x8x128xf32>
    %cst = arith.constant 0.000000e+00 : f32
    %17 = vector.broadcast %cst : f32 to vector<8x8x128xf32>
    %18 = arith.maximumf %16, %17 : vector<8x8x128xf32>
    %19 = vector.shape_cast %18 : vector<8x8x128xf32> to vector<64x128xf32>
    %20 = arith.truncf %19 : vector<64x128xf32> to vector<64x128xbf16>
    %c0_5 = arith.constant 0 : index
    %c0_6 = arith.constant 0 : index
    %21 = vector.load %arg9[%c0_5, %c0_6] : memref<128x16xbf16, #tpu.memory_space<vmem>>, vector<128x16xbf16>
    %cst_7 = arith.constant dense<0.000000e+00> : vector<64x16xf32>
    %22 = tpu.matmul %20, %21, %cst_7 {dimension_numbers = #tpu.dot_dimension_numbers<[1], [0], [0], [1], [0, 0, 1, 1], [], []>} : vector<64x128xbf16>, vector<128x16xbf16>, vector<64x16xf32> -> vector<64x16xf32>
    %c0_8 = arith.constant 0 : index
    %c0_9 = arith.constant 0 : index
    %23 = vector.load %arg10[%c0_8, %c0_9] : memref<1x16xf32, #tpu.memory_space<vmem>>, vector<1x16xf32>
    %24 = vector.broadcast %23 : vector<1x16xf32> to vector<64x16xf32>
    %25 = arith.addf %22, %24 : vector<64x16xf32>
    %26 = vector.shape_cast %25 : vector<64x16xf32> to vector<8x8x16xf32>
    %c0_10 = arith.constant 0 : index
    %c0_11 = arith.constant 0 : index
    %c0_12 = arith.constant 0 : index
    %c0_13 = arith.constant 0 : index
    %27 = vector.load %arg11[%c0_10, %c0_11, %c0_12, %c0_13] : memref<1x8x8x16xf32, #tpu.memory_space<vmem>>, vector<1x8x8x16xf32>
    %28 = vector.shape_cast %27 : vector<1x8x8x16xf32> to vector<8x8x16xf32>
    %29 = vector.shape_cast %26 : vector<8x8x16xf32> to vector<1x8x8x16xf32>
    tpu.vector_store %arg11[%c0_10, %c0_11, %c0_12, %c0_13], %29 {strides = array<i32>} : memref<1x8x8x16xf32, #tpu.memory_space<vmem>>, vector<1x8x8x16xf32>,
    return
  }
  func.func @transform_0(%arg0: i32, %arg1: i32) -> (i32, i32, i32) {
    %c0_i32 = arith.constant 0 : i32
    %c0_i32_0 = arith.constant 0 : i32
    %c0_i32_1 = arith.constant 0 : i32
    return %arg0, %c0_i32, %c0_i32_0 : i32, i32, i32
  }
  func.func @transform_1(%arg0: i32, %arg1: i32) -> (i32, i32) {
    %c0_i32 = arith.constant 0 : i32
    %c0_i32_0 = arith.constant 0 : i32
    %c0_i32_1 = arith.constant 0 : i32
    return %c0_i32, %c0_i32_0 : i32, i32
  }
  func.func @transform_2(%arg0: i32, %arg1: i32) -> (i32, i32) {
    %c0_i32 = arith.constant 0 : i32
    %c0_i32_0 = arith.constant 0 : i32
    %c0_i32_1 = arith.constant 0 : i32
    return %c0_i32, %c0_i32_0 : i32, i32
  }
  func.func @transform_3(%arg0: i32, %arg1: i32) -> (i32, i32) {
    %c0_i32 = arith.constant 0 : i32
    %c0_i32_0 = arith.constant 0 : i32
    %c0_i32_1 = arith.constant 0 : i32
    return %c0_i32, %c0_i32_0 : i32, i32
  }
  func.func @transform_4(%arg0: i32, %arg1: i32) -> (i32, i32) {
    %c0_i32 = arith.constant 0 : i32
    %c0_i32_0 = arith.constant 0 : i32
    %c0_i32_1 = arith.constant 0 : i32
    return %c0_i32, %c0_i32_0 : i32, i32
  }
  func.func @transform_5(%arg0: i32, %arg1: i32) -> (i32, i32) {
    %c0_i32 = arith.constant 0 : i32
    %c0_i32_0 = arith.constant 0 : i32
    %c0_i32_1 = arith.constant 0 : i32
    return %c0_i32, %c0_i32_0 : i32, i32
  }
  func.func @transform_6(%arg0: i32, %arg1: i32) -> (i32, i32) {
    %c0_i32 = arith.constant 0 : i32
    %c0_i32_0 = arith.constant 0 : i32
    %c0_i32_1 = arith.constant 0 : i32
    return %c0_i32, %c0_i32_0 : i32, i32
  }
  func.func @transform_7(%arg0: i32, %arg1: i32) -> (i32, i32) {
    %c0_i32 = arith.constant 0 : i32
    %c0_i32_0 = arith.constant 0 : i32
    %c0_i32_1 = arith.constant 0 : i32
    return %c0_i32, %c0_i32_0 : i32, i32
  }
  func.func @transform_8(%arg0: i32, %arg1: i32) -> (i32, i32) {
    %c0_i32 = arith.constant 0 : i32
    %c0_i32_0 = arith.constant 0 : i32
    %c0_i32_1 = arith.constant 0 : i32
    return %c0_i32, %c0_i32_0 : i32, i32
  }
  func.func @transform_9(%arg0: i32, %arg1: i32) -> (i32, i32, i32, i32) {
    %c0_i32 = arith.constant 0 : i32
    %c0_i32_0 = arith.constant 0 : i32
    %c0_i32_1 = arith.constant 0 : i32
    return %arg0, %arg1, %c0_i32, %c0_i32_0 : i32, i32, i32, i32
  }
}

module attributes {stable_mosaic.version = 11 : i64} {
  func.func @_fused_kernel(%arg0: i32, %arg1: i32, %arg2: memref<1x8x32xf32, #tpu.memory_space<vmem>>, %arg3: memref<32x128xf32, #tpu.memory_space<vmem>>, %arg4: memref<1x128xf32, #tpu.memory_space<vmem>>, %arg5: memref<1x128xf32, #tpu.memory_space<vmem>>, %arg6: memref<1x128xf32, #tpu.memory_space<vmem>>, %arg7: memref<128x128xf32, #tpu.memory_space<vmem>>, %arg8: memref<1x128xf32, #tpu.memory_space<vmem>>, %arg9: memref<128x16xbf16, #tpu.memory_space<vmem>>, %arg10: memref<1x16xf32, #tpu.memory_space<vmem>>, %arg11: memref<1x8x128xf32, #tpu.memory_space<vmem>>, %arg12: memref<8x128xf32, #tpu.memory_space<vmem>>) attributes {dimension_semantics = [#tpu.dimension_semantics<parallel>, #tpu.dimension_semantics<arbitrary>], iteration_bounds = array<i64: 2, 1>, scalar_prefetch = 0 : i64, scratch_operands = 1 : i64, tpu.core_type = #tpu.core_type<tc>, window_params = [{transform_indices = @transform_0, window_bounds = array<i64: 1, 8, 32>}, {pipeline_mode = #tpu.pipeline_mode<synchronous>, transform_indices = @transform_1, window_bounds = array<i64: 32, 128>}, {pipeline_mode = #tpu.pipeline_mode<synchronous>, transform_indices = @transform_2, window_bounds = array<i64: 1, 128>}, {pipeline_mode = #tpu.pipeline_mode<synchronous>, transform_indices = @transform_3, window_bounds = array<i64: 1, 128>}, {pipeline_mode = #tpu.pipeline_mode<synchronous>, transform_indices = @transform_4, window_bounds = array<i64: 1, 128>}, {pipeline_mode = #tpu.pipeline_mode<synchronous>, transform_indices = @transform_5, window_bounds = array<i64: 128, 128>}, {pipeline_mode = #tpu.pipeline_mode<synchronous>, transform_indices = @transform_6, window_bounds = array<i64: 1, 128>}, {pipeline_mode = #tpu.pipeline_mode<synchronous>, transform_indices = @transform_7, window_bounds = array<i64: 128, 16>}, {pipeline_mode = #tpu.pipeline_mode<synchronous>, transform_indices = @transform_8, window_bounds = array<i64: 1, 16>}, {transform_indices = @transform_9, window_bounds = array<i64: 1, 8, 128>}]} {
    %c0_i32 = arith.constant 0 : i32
    %0 = arith.cmpi eq, %arg1, %c0_i32 : i32
    %1 = arith.extui %0 : i1 to i32
    %c0_i32_0 = arith.constant 0 : i32
    %2 = arith.cmpi ne, %1, %c0_i32_0 : i32
    scf.if %2 {
      %c0_13 = arith.constant 0 : index
      %c0_14 = arith.constant 0 : index
      %c0_15 = arith.constant 0 : index
      %30 = vector.load %arg2[%c0_13, %c0_14, %c0_15] : memref<1x8x32xf32, #tpu.memory_space<vmem>>, vector<1x8x32xf32>
      %31 = vector.shape_cast %30 : vector<1x8x32xf32> to vector<8x32xf32>
      %c0_16 = arith.constant 0 : index
      %c0_17 = arith.constant 0 : index
      %32 = vector.load %arg3[%c0_16, %c0_17] : memref<32x128xf32, #tpu.memory_space<vmem>>, vector<32x128xf32>
      %cst_18 = arith.constant dense<0.000000e+00> : vector<8x128xf32>
      %33 = tpu.matmul %31, %32, %cst_18 {dimension_numbers = #tpu.dot_dimension_numbers<[1], [0], [0], [1], [0, 0, 1, 1], [], []>} : vector<8x32xf32>, vector<32x128xf32>, vector<8x128xf32> -> vector<8x128xf32>
      %c0_19 = arith.constant 0 : index
      %c0_20 = arith.constant 0 : index
      %34 = vector.load %arg4[%c0_19, %c0_20] : memref<1x128xf32, #tpu.memory_space<vmem>>, vector<1x128xf32>
      %35 = vector.broadcast %34 : vector<1x128xf32> to vector<8x128xf32>
      %36 = arith.addf %33, %35 : vector<8x128xf32>
      %37 = tpu.iota {dimensions = array<i32: 1>} : vector<1x128xi32>
      %c32_i32 = arith.constant 32 : i32
      %38 = vector.broadcast %c32_i32 : i32 to vector<1x128xi32>
      %39 = arith.cmpi slt, %37, %38 : vector<1x128xi32>
      %cst_21 = arith.constant dense<0.000000e+00> : vector<8xf32>
      %40 = vector.multi_reduction <add>, %36, %cst_21 [1] : vector<8x128xf32> to vector<8xf32>
      %41 = vector.shape_cast %40 : vector<8xf32> to vector<8x1xf32>
      %cst_22 = arith.constant 3.125000e-02 : f32
      %42 = vector.broadcast %cst_22 : f32 to vector<8x1xf32>
      %43 = arith.mulf %41, %42 : vector<8x1xf32>
      %44 = vector.broadcast %43 : vector<8x1xf32> to vector<8x128xf32>
      %45 = arith.subf %36, %44 : vector<8x128xf32>
      %cst_23 = arith.constant 0.000000e+00 : f32
      %46 = vector.shape_cast %39 : vector<1x128xi1> to vector<1x128xi1>
      %47 = vector.broadcast %46 : vector<1x128xi1> to vector<8x128xi1>
      %48 = vector.broadcast %cst_23 : f32 to vector<8x128xf32>
      %49 = arith.select %47, %45, %48 : vector<8x128xi1>, vector<8x128xf32>
      %50 = arith.mulf %49, %49 : vector<8x128xf32>
      %cst_24 = arith.constant dense<0.000000e+00> : vector<8xf32>
      %51 = vector.multi_reduction <add>, %50, %cst_24 [1] : vector<8x128xf32> to vector<8xf32>
      %52 = vector.shape_cast %51 : vector<8xf32> to vector<8x1xf32>
      %cst_25 = arith.constant 3.125000e-02 : f32
      %53 = vector.broadcast %cst_25 : f32 to vector<8x1xf32>
      %54 = arith.mulf %52, %53 : vector<8x1xf32>
      %cst_26 = arith.constant 9.99999974E-6 : f32
      %55 = vector.broadcast %cst_26 : f32 to vector<8x1xf32>
      %56 = arith.addf %54, %55 : vector<8x1xf32>
      %57 = math.rsqrt %56 : vector<8x1xf32>
      %58 = vector.broadcast %57 : vector<8x1xf32> to vector<8x128xf32>
      %59 = arith.mulf %49, %58 : vector<8x128xf32>
      %c0_27 = arith.constant 0 : index
      %c0_28 = arith.constant 0 : index
      %60 = vector.load %arg5[%c0_27, %c0_28] : memref<1x128xf32, #tpu.memory_space<vmem>>, vector<1x128xf32>
      %61 = vector.broadcast %60 : vector<1x128xf32> to vector<8x128xf32>
      %62 = arith.mulf %59, %61 : vector<8x128xf32>
      %c0_29 = arith.constant 0 : index
      %c0_30 = arith.constant 0 : index
      %63 = vector.load %arg6[%c0_29, %c0_30] : memref<1x128xf32, #tpu.memory_space<vmem>>, vector<1x128xf32>
      %64 = vector.broadcast %63 : vector<1x128xf32> to vector<8x128xf32>
      %65 = arith.addf %62, %64 : vector<8x128xf32>
      %cst_31 = arith.constant 0.000000e+00 : f32
      %66 = vector.broadcast %cst_31 : f32 to vector<8x128xf32>
      %67 = arith.maximumf %65, %66 : vector<8x128xf32>
      %c0_32 = arith.constant 0 : index
      %c0_33 = arith.constant 0 : index
      %68 = vector.load %arg7[%c0_32, %c0_33] : memref<128x128xf32, #tpu.memory_space<vmem>>, vector<128x128xf32>
      %cst_34 = arith.constant dense<0.000000e+00> : vector<8x128xf32>
      %69 = tpu.matmul %67, %68, %cst_34 {dimension_numbers = #tpu.dot_dimension_numbers<[1], [0], [0], [1], [0, 0, 1, 1], [], []>} : vector<8x128xf32>, vector<128x128xf32>, vector<8x128xf32> -> vector<8x128xf32>
      %c0_35 = arith.constant 0 : index
      %c0_36 = arith.constant 0 : index
      %70 = vector.load %arg12[%c0_35, %c0_36] : memref<8x128xf32, #tpu.memory_space<vmem>>, vector<8x128xf32>
      tpu.vector_store %arg12[%c0_35, %c0_36], %69 {strides = array<i32>} : memref<8x128xf32, #tpu.memory_space<vmem>>, vector<8x128xf32>,
    } else {
    }
    %c0 = arith.constant 0 : index
    %c0_1 = arith.constant 0 : index
    %3 = vector.load %arg12[%c0, %c0_1] : memref<8x128xf32, #tpu.memory_space<vmem>>, vector<8x128xf32>
    %c8_i32 = arith.constant 8 : i32
    %4 = arith.muli %arg1, %c8_i32 : i32
    %5 = tpu.assume_multiple %4, 8 : i32
    %6 = arith.index_cast %5 : i32 to index
    %c0_2 = arith.constant 0 : index
    %7 = vector.load %arg12[%6, %c0_2] : memref<8x128xf32, #tpu.memory_space<vmem>>, vector<8x128xf32>
    %8 = vector.shape_cast %3 : vector<8x128xf32> to vector<1x8x128xf32>
    %9 = vector.shape_cast %7 : vector<8x128xf32> to vector<8x1x128xf32>
    %10 = vector.broadcast %8 : vector<1x8x128xf32> to vector<8x8x128xf32>
    %11 = vector.broadcast %9 : vector<8x1x128xf32> to vector<8x8x128xf32>
    %12 = arith.subf %10, %11 : vector<8x8x128xf32>
    %c0_3 = arith.constant 0 : index
    %c0_4 = arith.constant 0 : index
    %13 = vector.load %arg8[%c0_3, %c0_4] : memref<1x128xf32, #tpu.memory_space<vmem>>, vector<1x128xf32>
    %14 = vector.shape_cast %13 : vector<1x128xf32> to vector<1x1x128xf32>
    %15 = vector.broadcast %14 : vector<1x1x128xf32> to vector<8x8x128xf32>
    %16 = arith.addf %12, %15 : vector<8x8x128xf32>
    %cst = arith.constant 0.000000e+00 : f32
    %17 = vector.broadcast %cst : f32 to vector<8x8x128xf32>
    %18 = arith.maximumf %16, %17 : vector<8x8x128xf32>
    %19 = vector.shape_cast %18 : vector<8x8x128xf32> to vector<64x128xf32>
    %20 = arith.truncf %19 : vector<64x128xf32> to vector<64x128xbf16>
    %c0_5 = arith.constant 0 : index
    %c0_6 = arith.constant 0 : index
    %21 = vector.load %arg9[%c0_5, %c0_6] : memref<128x16xbf16, #tpu.memory_space<vmem>>, vector<128x16xbf16>
    %cst_7 = arith.constant dense<0.000000e+00> : vector<64x16xf32>
    %22 = tpu.matmul %20, %21, %cst_7 {dimension_numbers = #tpu.dot_dimension_numbers<[1], [0], [0], [1], [0, 0, 1, 1], [], []>} : vector<64x128xbf16>, vector<128x16xbf16>, vector<64x16xf32> -> vector<64x16xf32>
    %c0_8 = arith.constant 0 : index
    %c0_9 = arith.constant 0 : index
    %23 = vector.load %arg10[%c0_8, %c0_9] : memref<1x16xf32, #tpu.memory_space<vmem>>, vector<1x16xf32>
    %24 = vector.broadcast %23 : vector<1x16xf32> to vector<64x16xf32>
    %25 = arith.addf %22, %24 : vector<64x16xf32>
    %26 = vector.shape_cast %25 : vector<64x16xf32> to vector<8x128xf32>
    %c0_10 = arith.constant 0 : index
    %c0_11 = arith.constant 0 : index
    %c0_12 = arith.constant 0 : index
    %27 = vector.load %arg11[%c0_10, %c0_11, %c0_12] : memref<1x8x128xf32, #tpu.memory_space<vmem>>, vector<1x8x128xf32>
    %28 = vector.shape_cast %27 : vector<1x8x128xf32> to vector<8x128xf32>
    %29 = vector.shape_cast %26 : vector<8x128xf32> to vector<1x8x128xf32>
    tpu.vector_store %arg11[%c0_10, %c0_11, %c0_12], %29 {strides = array<i32>} : memref<1x8x128xf32, #tpu.memory_space<vmem>>, vector<1x8x128xf32>,
    return
  }
  func.func @transform_0(%arg0: i32, %arg1: i32) -> (i32, i32, i32) {
    %c0_i32 = arith.constant 0 : i32
    %c0_i32_0 = arith.constant 0 : i32
    %c0_i32_1 = arith.constant 0 : i32
    return %arg0, %c0_i32, %c0_i32_0 : i32, i32, i32
  }
  func.func @transform_1(%arg0: i32, %arg1: i32) -> (i32, i32) {
    %c0_i32 = arith.constant 0 : i32
    %c0_i32_0 = arith.constant 0 : i32
    %c0_i32_1 = arith.constant 0 : i32
    return %c0_i32, %c0_i32_0 : i32, i32
  }
  func.func @transform_2(%arg0: i32, %arg1: i32) -> (i32, i32) {
    %c0_i32 = arith.constant 0 : i32
    %c0_i32_0 = arith.constant 0 : i32
    %c0_i32_1 = arith.constant 0 : i32
    return %c0_i32, %c0_i32_0 : i32, i32
  }
  func.func @transform_3(%arg0: i32, %arg1: i32) -> (i32, i32) {
    %c0_i32 = arith.constant 0 : i32
    %c0_i32_0 = arith.constant 0 : i32
    %c0_i32_1 = arith.constant 0 : i32
    return %c0_i32, %c0_i32_0 : i32, i32
  }
  func.func @transform_4(%arg0: i32, %arg1: i32) -> (i32, i32) {
    %c0_i32 = arith.constant 0 : i32
    %c0_i32_0 = arith.constant 0 : i32
    %c0_i32_1 = arith.constant 0 : i32
    return %c0_i32, %c0_i32_0 : i32, i32
  }
  func.func @transform_5(%arg0: i32, %arg1: i32) -> (i32, i32) {
    %c0_i32 = arith.constant 0 : i32
    %c0_i32_0 = arith.constant 0 : i32
    %c0_i32_1 = arith.constant 0 : i32
    return %c0_i32, %c0_i32_0 : i32, i32
  }
  func.func @transform_6(%arg0: i32, %arg1: i32) -> (i32, i32) {
    %c0_i32 = arith.constant 0 : i32
    %c0_i32_0 = arith.constant 0 : i32
    %c0_i32_1 = arith.constant 0 : i32
    return %c0_i32, %c0_i32_0 : i32, i32
  }
  func.func @transform_7(%arg0: i32, %arg1: i32) -> (i32, i32) {
    %c0_i32 = arith.constant 0 : i32
    %c0_i32_0 = arith.constant 0 : i32
    %c0_i32_1 = arith.constant 0 : i32
    return %c0_i32, %c0_i32_0 : i32, i32
  }
  func.func @transform_8(%arg0: i32, %arg1: i32) -> (i32, i32) {
    %c0_i32 = arith.constant 0 : i32
    %c0_i32_0 = arith.constant 0 : i32
    %c0_i32_1 = arith.constant 0 : i32
    return %c0_i32, %c0_i32_0 : i32, i32
  }
  func.func @transform_9(%arg0: i32, %arg1: i32) -> (i32, i32, i32) {
    %c0_i32 = arith.constant 0 : i32
    %c0_i32_0 = arith.constant 0 : i32
    return %arg0, %arg1, %c0_i32 : i32, i32, i32
  }
}

module attributes {stable_mosaic.version = 11 : i64} {
  func.func @_fused_kernel(%arg0: i32, %arg1: i32, %arg2: memref<1x8x32xf32, #tpu.memory_space<vmem>>, %arg3: memref<32x128xf32, #tpu.memory_space<vmem>>, %arg4: memref<1x128xf32, #tpu.memory_space<vmem>>, %arg5: memref<1x128xf32, #tpu.memory_space<vmem>>, %arg6: memref<1x128xf32, #tpu.memory_space<vmem>>, %arg7: memref<128x128xf32, #tpu.memory_space<vmem>>, %arg8: memref<1x128xf32, #tpu.memory_space<vmem>>, %arg9: memref<128x16xbf16, #tpu.memory_space<vmem>>, %arg10: memref<1x16xf32, #tpu.memory_space<vmem>>, %arg11: memref<1x8x8x16xf32, #tpu.memory_space<vmem>>, %arg12: memref<8x128xf32, #tpu.memory_space<vmem>>) attributes {dimension_semantics = [#tpu.dimension_semantics<parallel>, #tpu.dimension_semantics<arbitrary>], iteration_bounds = array<i64: 2, 1>, scalar_prefetch = 0 : i64, scratch_operands = 1 : i64, tpu.core_type = #tpu.core_type<tc>, window_params = [{transform_indices = @transform_0, window_bounds = array<i64: 1, 8, 32>}, {pipeline_mode = #tpu.pipeline_mode<synchronous>, transform_indices = @transform_1, window_bounds = array<i64: 32, 128>}, {pipeline_mode = #tpu.pipeline_mode<synchronous>, transform_indices = @transform_2, window_bounds = array<i64: 1, 128>}, {pipeline_mode = #tpu.pipeline_mode<synchronous>, transform_indices = @transform_3, window_bounds = array<i64: 1, 128>}, {pipeline_mode = #tpu.pipeline_mode<synchronous>, transform_indices = @transform_4, window_bounds = array<i64: 1, 128>}, {pipeline_mode = #tpu.pipeline_mode<synchronous>, transform_indices = @transform_5, window_bounds = array<i64: 128, 128>}, {pipeline_mode = #tpu.pipeline_mode<synchronous>, transform_indices = @transform_6, window_bounds = array<i64: 1, 128>}, {pipeline_mode = #tpu.pipeline_mode<synchronous>, transform_indices = @transform_7, window_bounds = array<i64: 128, 16>}, {pipeline_mode = #tpu.pipeline_mode<synchronous>, transform_indices = @transform_8, window_bounds = array<i64: 1, 16>}, {transform_indices = @transform_9, window_bounds = array<i64: 1, 8, 8, 16>}]} {
    %c0_i32 = arith.constant 0 : i32
    %0 = arith.cmpi eq, %arg1, %c0_i32 : i32
    %1 = arith.extui %0 : i1 to i32
    %c0_i32_0 = arith.constant 0 : i32
    %2 = arith.cmpi ne, %1, %c0_i32_0 : i32
    scf.if %2 {
      %c0_14 = arith.constant 0 : index
      %c0_15 = arith.constant 0 : index
      %c0_16 = arith.constant 0 : index
      %30 = vector.load %arg2[%c0_14, %c0_15, %c0_16] : memref<1x8x32xf32, #tpu.memory_space<vmem>>, vector<1x8x32xf32>
      %31 = vector.shape_cast %30 : vector<1x8x32xf32> to vector<8x32xf32>
      %c0_17 = arith.constant 0 : index
      %c0_18 = arith.constant 0 : index
      %32 = vector.load %arg3[%c0_17, %c0_18] : memref<32x128xf32, #tpu.memory_space<vmem>>, vector<32x128xf32>
      %cst_19 = arith.constant dense<0.000000e+00> : vector<8x128xf32>
      %33 = tpu.matmul %31, %32, %cst_19 {dimension_numbers = #tpu.dot_dimension_numbers<[1], [0], [0], [1], [0, 0, 1, 1], [], []>} : vector<8x32xf32>, vector<32x128xf32>, vector<8x128xf32> -> vector<8x128xf32>
      %c0_20 = arith.constant 0 : index
      %c0_21 = arith.constant 0 : index
      %34 = vector.load %arg4[%c0_20, %c0_21] : memref<1x128xf32, #tpu.memory_space<vmem>>, vector<1x128xf32>
      %35 = vector.broadcast %34 : vector<1x128xf32> to vector<8x128xf32>
      %36 = arith.addf %33, %35 : vector<8x128xf32>
      %37 = tpu.iota {dimensions = array<i32: 1>} : vector<1x128xi32>
      %c32_i32 = arith.constant 32 : i32
      %38 = vector.broadcast %c32_i32 : i32 to vector<1x128xi32>
      %39 = arith.cmpi slt, %37, %38 : vector<1x128xi32>
      %cst_22 = arith.constant dense<0.000000e+00> : vector<8xf32>
      %40 = vector.multi_reduction <add>, %36, %cst_22 [1] : vector<8x128xf32> to vector<8xf32>
      %41 = vector.shape_cast %40 : vector<8xf32> to vector<8x1xf32>
      %cst_23 = arith.constant 3.125000e-02 : f32
      %42 = vector.broadcast %cst_23 : f32 to vector<8x1xf32>
      %43 = arith.mulf %41, %42 : vector<8x1xf32>
      %44 = vector.broadcast %43 : vector<8x1xf32> to vector<8x128xf32>
      %45 = arith.subf %36, %44 : vector<8x128xf32>
      %cst_24 = arith.constant 0.000000e+00 : f32
      %46 = vector.shape_cast %39 : vector<1x128xi1> to vector<1x128xi1>
      %47 = vector.broadcast %46 : vector<1x128xi1> to vector<8x128xi1>
      %48 = vector.broadcast %cst_24 : f32 to vector<8x128xf32>
      %49 = arith.select %47, %45, %48 : vector<8x128xi1>, vector<8x128xf32>
      %50 = arith.mulf %49, %49 : vector<8x128xf32>
      %cst_25 = arith.constant dense<0.000000e+00> : vector<8xf32>
      %51 = vector.multi_reduction <add>, %50, %cst_25 [1] : vector<8x128xf32> to vector<8xf32>
      %52 = vector.shape_cast %51 : vector<8xf32> to vector<8x1xf32>
      %cst_26 = arith.constant 3.125000e-02 : f32
      %53 = vector.broadcast %cst_26 : f32 to vector<8x1xf32>
      %54 = arith.mulf %52, %53 : vector<8x1xf32>
      %cst_27 = arith.constant 9.99999974E-6 : f32
      %55 = vector.broadcast %cst_27 : f32 to vector<8x1xf32>
      %56 = arith.addf %54, %55 : vector<8x1xf32>
      %57 = math.rsqrt %56 : vector<8x1xf32>
      %58 = vector.broadcast %57 : vector<8x1xf32> to vector<8x128xf32>
      %59 = arith.mulf %49, %58 : vector<8x128xf32>
      %c0_28 = arith.constant 0 : index
      %c0_29 = arith.constant 0 : index
      %60 = vector.load %arg5[%c0_28, %c0_29] : memref<1x128xf32, #tpu.memory_space<vmem>>, vector<1x128xf32>
      %61 = vector.broadcast %60 : vector<1x128xf32> to vector<8x128xf32>
      %62 = arith.mulf %59, %61 : vector<8x128xf32>
      %c0_30 = arith.constant 0 : index
      %c0_31 = arith.constant 0 : index
      %63 = vector.load %arg6[%c0_30, %c0_31] : memref<1x128xf32, #tpu.memory_space<vmem>>, vector<1x128xf32>
      %64 = vector.broadcast %63 : vector<1x128xf32> to vector<8x128xf32>
      %65 = arith.addf %62, %64 : vector<8x128xf32>
      %cst_32 = arith.constant 0.000000e+00 : f32
      %66 = vector.broadcast %cst_32 : f32 to vector<8x128xf32>
      %67 = arith.maximumf %65, %66 : vector<8x128xf32>
      %c0_33 = arith.constant 0 : index
      %c0_34 = arith.constant 0 : index
      %68 = vector.load %arg7[%c0_33, %c0_34] : memref<128x128xf32, #tpu.memory_space<vmem>>, vector<128x128xf32>
      %cst_35 = arith.constant dense<0.000000e+00> : vector<8x128xf32>
      %69 = tpu.matmul %67, %68, %cst_35 {dimension_numbers = #tpu.dot_dimension_numbers<[1], [0], [0], [1], [0, 0, 1, 1], [], []>} : vector<8x128xf32>, vector<128x128xf32>, vector<8x128xf32> -> vector<8x128xf32>
      %c0_36 = arith.constant 0 : index
      %c0_37 = arith.constant 0 : index
      %70 = vector.load %arg12[%c0_36, %c0_37] : memref<8x128xf32, #tpu.memory_space<vmem>>, vector<8x128xf32>
      tpu.vector_store %arg12[%c0_36, %c0_37], %69 {strides = array<i32>} : memref<8x128xf32, #tpu.memory_space<vmem>>, vector<8x128xf32>,
    } else {
    }
    %c0 = arith.constant 0 : index
    %c0_1 = arith.constant 0 : index
    %3 = vector.load %arg12[%c0, %c0_1] : memref<8x128xf32, #tpu.memory_space<vmem>>, vector<8x128xf32>
    %c8_i32 = arith.constant 8 : i32
    %4 = arith.muli %arg1, %c8_i32 : i32
    %5 = tpu.assume_multiple %4, 8 : i32
    %6 = arith.index_cast %5 : i32 to index
    %c0_2 = arith.constant 0 : index
    %7 = vector.load %arg12[%6, %c0_2] : memref<8x128xf32, #tpu.memory_space<vmem>>, vector<8x128xf32>
    %8 = vector.shape_cast %3 : vector<8x128xf32> to vector<1x8x128xf32>
    %9 = vector.shape_cast %7 : vector<8x128xf32> to vector<8x1x128xf32>
    %10 = vector.broadcast %8 : vector<1x8x128xf32> to vector<8x8x128xf32>
    %11 = vector.broadcast %9 : vector<8x1x128xf32> to vector<8x8x128xf32>
    %12 = arith.subf %10, %11 : vector<8x8x128xf32>
    %c0_3 = arith.constant 0 : index
    %c0_4 = arith.constant 0 : index
    %13 = vector.load %arg8[%c0_3, %c0_4] : memref<1x128xf32, #tpu.memory_space<vmem>>, vector<1x128xf32>
    %14 = vector.shape_cast %13 : vector<1x128xf32> to vector<1x1x128xf32>
    %15 = vector.broadcast %14 : vector<1x1x128xf32> to vector<8x8x128xf32>
    %16 = arith.addf %12, %15 : vector<8x8x128xf32>
    %cst = arith.constant 0.000000e+00 : f32
    %17 = vector.broadcast %cst : f32 to vector<8x8x128xf32>
    %18 = arith.maximumf %16, %17 : vector<8x8x128xf32>
    %19 = vector.shape_cast %18 : vector<8x8x128xf32> to vector<64x128xf32>
    %20 = arith.truncf %19 : vector<64x128xf32> to vector<64x128xbf16>
    %c0_5 = arith.constant 0 : index
    %c0_6 = arith.constant 0 : index
    %21 = vector.load %arg9[%c0_5, %c0_6] : memref<128x16xbf16, #tpu.memory_space<vmem>>, vector<128x16xbf16>
    %cst_7 = arith.constant dense<0.000000e+00> : vector<64x16xf32>
    %22 = tpu.matmul %20, %21, %cst_7 {dimension_numbers = #tpu.dot_dimension_numbers<[1], [0], [0], [1], [0, 0, 1, 1], [], []>} : vector<64x128xbf16>, vector<128x16xbf16>, vector<64x16xf32> -> vector<64x16xf32>
    %c0_8 = arith.constant 0 : index
    %c0_9 = arith.constant 0 : index
    %23 = vector.load %arg10[%c0_8, %c0_9] : memref<1x16xf32, #tpu.memory_space<vmem>>, vector<1x16xf32>
    %24 = vector.broadcast %23 : vector<1x16xf32> to vector<64x16xf32>
    %25 = arith.addf %22, %24 : vector<64x16xf32>
    %26 = vector.shape_cast %25 : vector<64x16xf32> to vector<8x8x16xf32>
    %c0_10 = arith.constant 0 : index
    %c0_11 = arith.constant 0 : index
    %c0_12 = arith.constant 0 : index
    %c0_13 = arith.constant 0 : index
    %27 = vector.load %arg11[%c0_10, %c0_11, %c0_12, %c0_13] : memref<1x8x8x16xf32, #tpu.memory_space<vmem>>, vector<1x8x8x16xf32>
    %28 = vector.shape_cast %27 : vector<1x8x8x16xf32> to vector<8x8x16xf32>
    %29 = vector.shape_cast %26 : vector<8x8x16xf32> to vector<1x8x8x16xf32>
    tpu.vector_store %arg11[%c0_10, %c0_11, %c0_12, %c0_13], %29 {strides = array<i32>} : memref<1x8x8x16xf32, #tpu.memory_space<vmem>>, vector<1x8x8x16xf32>,
    return
  }
  func.func @transform_0(%arg0: i32, %arg1: i32) -> (i32, i32, i32) {
    %c0_i32 = arith.constant 0 : i32
    %c0_i32_0 = arith.constant 0 : i32
    %c0_i32_1 = arith.constant 0 : i32
    return %arg0, %c0_i32, %c0_i32_0 : i32, i32, i32
  }
  func.func @transform_1(%arg0: i32, %arg1: i32) -> (i32, i32) {
    %c0_i32 = arith.constant 0 : i32
    %c0_i32_0 = arith.constant 0 : i32
    %c0_i32_1 = arith.constant 0 : i32
    return %c0_i32, %c0_i32_0 : i32, i32
  }
  func.func @transform_2(%arg0: i32, %arg1: i32) -> (i32, i32) {
    %c0_i32 = arith.constant 0 : i32
    %c0_i32_0 = arith.constant 0 : i32
    %c0_i32_1 = arith.constant 0 : i32
    return %c0_i32, %c0_i32_0 : i32, i32
  }
  func.func @transform_3(%arg0: i32, %arg1: i32) -> (i32, i32) {
    %c0_i32 = arith.constant 0 : i32
    %c0_i32_0 = arith.constant 0 : i32
    %c0_i32_1 = arith.constant 0 : i32
    return %c0_i32, %c0_i32_0 : i32, i32
  }
  func.func @transform_4(%arg0: i32, %arg1: i32) -> (i32, i32) {
    %c0_i32 = arith.constant 0 : i32
    %c0_i32_0 = arith.constant 0 : i32
    %c0_i32_1 = arith.constant 0 : i32
    return %c0_i32, %c0_i32_0 : i32, i32
  }
  func.func @transform_5(%arg0: i32, %arg1: i32) -> (i32, i32) {
    %c0_i32 = arith.constant 0 : i32
    %c0_i32_0 = arith.constant 0 : i32
    %c0_i32_1 = arith.constant 0 : i32
    return %c0_i32, %c0_i32_0 : i32, i32
  }
  func.func @transform_6(%arg0: i32, %arg1: i32) -> (i32, i32) {
    %c0_i32 = arith.constant 0 : i32
    %c0_i32_0 = arith.constant 0 : i32
    %c0_i32_1 = arith.constant 0 : i32
    return %c0_i32, %c0_i32_0 : i32, i32
  }
  func.func @transform_7(%arg0: i32, %arg1: i32) -> (i32, i32) {
    %c0_i32 = arith.constant 0 : i32
    %c0_i32_0 = arith.constant 0 : i32
    %c0_i32_1 = arith.constant 0 : i32
    return %c0_i32, %c0_i32_0 : i32, i32
  }
  func.func @transform_8(%arg0: i32, %arg1: i32) -> (i32, i32) {
    %c0_i32 = arith.constant 0 : i32
    %c0_i32_0 = arith.constant 0 : i32
    %c0_i32_1 = arith.constant 0 : i32
    return %c0_i32, %c0_i32_0 : i32, i32
  }
  func.func @transform_9(%arg0: i32, %arg1: i32) -> (i32, i32, i32, i32) {
    %c0_i32 = arith.constant 0 : i32
    %c0_i32_0 = arith.constant 0 : i32
    %c0_i32_1 = arith.constant 0 : i32
    return %arg0, %arg1, %c0_i32, %c0_i32_0 : i32, i32, i32, i32
  }
}

module attributes {stable_mosaic.version = 11 : i64} {
  func.func @_fused_kernel(%arg0: i32, %arg1: i32, %arg2: memref<1x8x32xf32, #tpu.memory_space<vmem>>, %arg3: memref<32x128xf32, #tpu.memory_space<vmem>>, %arg4: memref<1x128xf32, #tpu.memory_space<vmem>>, %arg5: memref<1x128xf32, #tpu.memory_space<vmem>>, %arg6: memref<1x128xf32, #tpu.memory_space<vmem>>, %arg7: memref<128x128xf32, #tpu.memory_space<vmem>>, %arg8: memref<1x128xf32, #tpu.memory_space<vmem>>, %arg9: memref<128x16xbf16, #tpu.memory_space<vmem>>, %arg10: memref<1x16xf32, #tpu.memory_space<vmem>>, %arg11: memref<1x8x8x16xf32, #tpu.memory_space<vmem>>, %arg12: memref<8x128xf32, #tpu.memory_space<vmem>>) attributes {dimension_semantics = [#tpu.dimension_semantics<parallel>, #tpu.dimension_semantics<arbitrary>], iteration_bounds = array<i64: 2, 1>, scalar_prefetch = 0 : i64, scratch_operands = 1 : i64, tpu.core_type = #tpu.core_type<tc>, window_params = [{transform_indices = @transform_0, window_bounds = array<i64: 1, 8, 32>}, {pipeline_mode = #tpu.pipeline_mode<synchronous>, transform_indices = @transform_1, window_bounds = array<i64: 32, 128>}, {pipeline_mode = #tpu.pipeline_mode<synchronous>, transform_indices = @transform_2, window_bounds = array<i64: 1, 128>}, {pipeline_mode = #tpu.pipeline_mode<synchronous>, transform_indices = @transform_3, window_bounds = array<i64: 1, 128>}, {pipeline_mode = #tpu.pipeline_mode<synchronous>, transform_indices = @transform_4, window_bounds = array<i64: 1, 128>}, {pipeline_mode = #tpu.pipeline_mode<synchronous>, transform_indices = @transform_5, window_bounds = array<i64: 128, 128>}, {pipeline_mode = #tpu.pipeline_mode<synchronous>, transform_indices = @transform_6, window_bounds = array<i64: 1, 128>}, {pipeline_mode = #tpu.pipeline_mode<synchronous>, transform_indices = @transform_7, window_bounds = array<i64: 128, 16>}, {pipeline_mode = #tpu.pipeline_mode<synchronous>, transform_indices = @transform_8, window_bounds = array<i64: 1, 16>}, {transform_indices = @transform_9, window_bounds = array<i64: 1, 8, 8, 16>}]} {
    %c0_i32 = arith.constant 0 : i32
    %0 = arith.cmpi eq, %arg1, %c0_i32 : i32
    %1 = arith.extui %0 : i1 to i32
    %c0_i32_0 = arith.constant 0 : i32
    %2 = arith.cmpi ne, %1, %c0_i32_0 : i32
    scf.if %2 {
      %c0_14 = arith.constant 0 : index
      %c0_15 = arith.constant 0 : index
      %c0_16 = arith.constant 0 : index
      %30 = vector.load %arg2[%c0_14, %c0_15, %c0_16] : memref<1x8x32xf32, #tpu.memory_space<vmem>>, vector<1x8x32xf32>
      %31 = vector.shape_cast %30 : vector<1x8x32xf32> to vector<8x32xf32>
      %c0_17 = arith.constant 0 : index
      %c0_18 = arith.constant 0 : index
      %32 = vector.load %arg3[%c0_17, %c0_18] : memref<32x128xf32, #tpu.memory_space<vmem>>, vector<32x128xf32>
      %cst_19 = arith.constant dense<0.000000e+00> : vector<8x128xf32>
      %33 = tpu.matmul %31, %32, %cst_19 {dimension_numbers = #tpu.dot_dimension_numbers<[1], [0], [0], [1], [0, 0, 1, 1], [], []>} : vector<8x32xf32>, vector<32x128xf32>, vector<8x128xf32> -> vector<8x128xf32>
      %c0_20 = arith.constant 0 : index
      %c0_21 = arith.constant 0 : index
      %34 = vector.load %arg4[%c0_20, %c0_21] : memref<1x128xf32, #tpu.memory_space<vmem>>, vector<1x128xf32>
      %35 = vector.broadcast %34 : vector<1x128xf32> to vector<8x128xf32>
      %36 = arith.addf %33, %35 : vector<8x128xf32>
      %37 = tpu.iota {dimensions = array<i32: 1>} : vector<1x128xi32>
      %c32_i32 = arith.constant 32 : i32
      %38 = vector.broadcast %c32_i32 : i32 to vector<1x128xi32>
      %39 = arith.cmpi slt, %37, %38 : vector<1x128xi32>
      %cst_22 = arith.constant dense<0.000000e+00> : vector<8xf32>
      %40 = vector.multi_reduction <add>, %36, %cst_22 [1] : vector<8x128xf32> to vector<8xf32>
      %41 = vector.shape_cast %40 : vector<8xf32> to vector<8x1xf32>
      %cst_23 = arith.constant 3.125000e-02 : f32
      %42 = vector.broadcast %cst_23 : f32 to vector<8x1xf32>
      %43 = arith.mulf %41, %42 : vector<8x1xf32>
      %44 = vector.broadcast %43 : vector<8x1xf32> to vector<8x128xf32>
      %45 = arith.subf %36, %44 : vector<8x128xf32>
      %cst_24 = arith.constant 0.000000e+00 : f32
      %46 = vector.shape_cast %39 : vector<1x128xi1> to vector<1x128xi1>
      %47 = vector.broadcast %46 : vector<1x128xi1> to vector<8x128xi1>
      %48 = vector.broadcast %cst_24 : f32 to vector<8x128xf32>
      %49 = arith.select %47, %45, %48 : vector<8x128xi1>, vector<8x128xf32>
      %50 = arith.mulf %49, %49 : vector<8x128xf32>
      %cst_25 = arith.constant dense<0.000000e+00> : vector<8xf32>
      %51 = vector.multi_reduction <add>, %50, %cst_25 [1] : vector<8x128xf32> to vector<8xf32>
      %52 = vector.shape_cast %51 : vector<8xf32> to vector<8x1xf32>
      %cst_26 = arith.constant 3.125000e-02 : f32
      %53 = vector.broadcast %cst_26 : f32 to vector<8x1xf32>
      %54 = arith.mulf %52, %53 : vector<8x1xf32>
      %cst_27 = arith.constant 9.99999974E-6 : f32
      %55 = vector.broadcast %cst_27 : f32 to vector<8x1xf32>
      %56 = arith.addf %54, %55 : vector<8x1xf32>
      %57 = math.rsqrt %56 : vector<8x1xf32>
      %58 = vector.broadcast %57 : vector<8x1xf32> to vector<8x128xf32>
      %59 = arith.mulf %49, %58 : vector<8x128xf32>
      %c0_28 = arith.constant 0 : index
      %c0_29 = arith.constant 0 : index
      %60 = vector.load %arg5[%c0_28, %c0_29] : memref<1x128xf32, #tpu.memory_space<vmem>>, vector<1x128xf32>
      %61 = vector.broadcast %60 : vector<1x128xf32> to vector<8x128xf32>
      %62 = arith.mulf %59, %61 : vector<8x128xf32>
      %c0_30 = arith.constant 0 : index
      %c0_31 = arith.constant 0 : index
      %63 = vector.load %arg6[%c0_30, %c0_31] : memref<1x128xf32, #tpu.memory_space<vmem>>, vector<1x128xf32>
      %64 = vector.broadcast %63 : vector<1x128xf32> to vector<8x128xf32>
      %65 = arith.addf %62, %64 : vector<8x128xf32>
      %cst_32 = arith.constant 0.000000e+00 : f32
      %66 = vector.broadcast %cst_32 : f32 to vector<8x128xf32>
      %67 = arith.maximumf %65, %66 : vector<8x128xf32>
      %c0_33 = arith.constant 0 : index
      %c0_34 = arith.constant 0 : index
      %68 = vector.load %arg7[%c0_33, %c0_34] : memref<128x128xf32, #tpu.memory_space<vmem>>, vector<128x128xf32>
      %cst_35 = arith.constant dense<0.000000e+00> : vector<8x128xf32>
      %69 = tpu.matmul %67, %68, %cst_35 {dimension_numbers = #tpu.dot_dimension_numbers<[1], [0], [0], [1], [0, 0, 1, 1], [], []>} : vector<8x128xf32>, vector<128x128xf32>, vector<8x128xf32> -> vector<8x128xf32>
      %c0_36 = arith.constant 0 : index
      %c0_37 = arith.constant 0 : index
      %70 = vector.load %arg12[%c0_36, %c0_37] : memref<8x128xf32, #tpu.memory_space<vmem>>, vector<8x128xf32>
      tpu.vector_store %arg12[%c0_36, %c0_37], %69 {strides = array<i32>} : memref<8x128xf32, #tpu.memory_space<vmem>>, vector<8x128xf32>,
    } else {
    }
    %c0 = arith.constant 0 : index
    %c0_1 = arith.constant 0 : index
    %3 = vector.load %arg12[%c0, %c0_1] : memref<8x128xf32, #tpu.memory_space<vmem>>, vector<8x128xf32>
    %c8_i32 = arith.constant 8 : i32
    %4 = arith.muli %arg1, %c8_i32 : i32
    %5 = tpu.assume_multiple %4, 8 : i32
    %6 = arith.index_cast %5 : i32 to index
    %c0_2 = arith.constant 0 : index
    %7 = vector.load %arg12[%6, %c0_2] : memref<8x128xf32, #tpu.memory_space<vmem>>, vector<8x128xf32>
    %8 = vector.shape_cast %3 : vector<8x128xf32> to vector<1x8x128xf32>
    %9 = vector.shape_cast %7 : vector<8x128xf32> to vector<8x1x128xf32>
    %10 = vector.broadcast %8 : vector<1x8x128xf32> to vector<8x8x128xf32>
    %11 = vector.broadcast %9 : vector<8x1x128xf32> to vector<8x8x128xf32>
    %12 = arith.subf %10, %11 : vector<8x8x128xf32>
    %c0_3 = arith.constant 0 : index
    %c0_4 = arith.constant 0 : index
    %13 = vector.load %arg8[%c0_3, %c0_4] : memref<1x128xf32, #tpu.memory_space<vmem>>, vector<1x128xf32>
    %14 = vector.shape_cast %13 : vector<1x128xf32> to vector<1x1x128xf32>
    %15 = vector.broadcast %14 : vector<1x1x128xf32> to vector<8x8x128xf32>
    %16 = arith.addf %12, %15 : vector<8x8x128xf32>
    %cst = arith.constant 0.000000e+00 : f32
    %17 = vector.broadcast %cst : f32 to vector<8x8x128xf32>
    %18 = arith.maximumf %16, %17 : vector<8x8x128xf32>
    %19 = vector.shape_cast %18 : vector<8x8x128xf32> to vector<64x128xf32>
    %20 = arith.truncf %19 : vector<64x128xf32> to vector<64x128xbf16>
    %c0_5 = arith.constant 0 : index
    %c0_6 = arith.constant 0 : index
    %21 = vector.load %arg9[%c0_5, %c0_6] : memref<128x16xbf16, #tpu.memory_space<vmem>>, vector<128x16xbf16>
    %cst_7 = arith.constant dense<0.000000e+00> : vector<64x16xf32>
    %22 = tpu.matmul %20, %21, %cst_7 {dimension_numbers = #tpu.dot_dimension_numbers<[1], [0], [0], [1], [0, 0, 1, 1], [], []>} : vector<64x128xbf16>, vector<128x16xbf16>, vector<64x16xf32> -> vector<64x16xf32>
    %c0_8 = arith.constant 0 : index
    %c0_9 = arith.constant 0 : index
    %23 = vector.load %arg10[%c0_8, %c0_9] : memref<1x16xf32, #tpu.memory_space<vmem>>, vector<1x16xf32>
    %24 = vector.broadcast %23 : vector<1x16xf32> to vector<64x16xf32>
    %25 = arith.addf %22, %24 : vector<64x16xf32>
    %26 = vector.shape_cast %25 : vector<64x16xf32> to vector<8x8x16xf32>
    %c0_10 = arith.constant 0 : index
    %c0_11 = arith.constant 0 : index
    %c0_12 = arith.constant 0 : index
    %c0_13 = arith.constant 0 : index
    %27 = vector.load %arg11[%c0_10, %c0_11, %c0_12, %c0_13] : memref<1x8x8x16xf32, #tpu.memory_space<vmem>>, vector<1x8x8x16xf32>
    %28 = vector.shape_cast %27 : vector<1x8x8x16xf32> to vector<8x8x16xf32>
    %29 = vector.shape_cast %26 : vector<8x8x16xf32> to vector<1x8x8x16xf32>
    tpu.vector_store %arg11[%c0_10, %c0_11, %c0_12, %c0_13], %29 {strides = array<i32>} : memref<1x8x8x16xf32, #tpu.memory_space<vmem>>, vector<1x8x8x16xf32>,
    return
  }
  func.func @transform_0(%arg0: i32, %arg1: i32) -> (i32, i32, i32) {
    %c0_i32 = arith.constant 0 : i32
    %c0_i32_0 = arith.constant 0 : i32
    %c0_i32_1 = arith.constant 0 : i32
    return %arg0, %c0_i32, %c0_i32_0 : i32, i32, i32
  }
  func.func @transform_1(%arg0: i32, %arg1: i32) -> (i32, i32) {
    %c0_i32 = arith.constant 0 : i32
    %c0_i32_0 = arith.constant 0 : i32
    %c0_i32_1 = arith.constant 0 : i32
    return %c0_i32, %c0_i32_0 : i32, i32
  }
  func.func @transform_2(%arg0: i32, %arg1: i32) -> (i32, i32) {
    %c0_i32 = arith.constant 0 : i32
    %c0_i32_0 = arith.constant 0 : i32
    %c0_i32_1 = arith.constant 0 : i32
    return %c0_i32, %c0_i32_0 : i32, i32
  }
  func.func @transform_3(%arg0: i32, %arg1: i32) -> (i32, i32) {
    %c0_i32 = arith.constant 0 : i32
    %c0_i32_0 = arith.constant 0 : i32
    %c0_i32_1 = arith.constant 0 : i32
    return %c0_i32, %c0_i32_0 : i32, i32
  }
  func.func @transform_4(%arg0: i32, %arg1: i32) -> (i32, i32) {
    %c0_i32 = arith.constant 0 : i32
    %c0_i32_0 = arith.constant 0 : i32
    %c0_i32_1 = arith.constant 0 : i32
    return %c0_i32, %c0_i32_0 : i32, i32
  }
  func.func @transform_5(%arg0: i32, %arg1: i32) -> (i32, i32) {
    %c0_i32 = arith.constant 0 : i32
    %c0_i32_0 = arith.constant 0 : i32
    %c0_i32_1 = arith.constant 0 : i32
    return %c0_i32, %c0_i32_0 : i32, i32
  }
  func.func @transform_6(%arg0: i32, %arg1: i32) -> (i32, i32) {
    %c0_i32 = arith.constant 0 : i32
    %c0_i32_0 = arith.constant 0 : i32
    %c0_i32_1 = arith.constant 0 : i32
    return %c0_i32, %c0_i32_0 : i32, i32
  }
  func.func @transform_7(%arg0: i32, %arg1: i32) -> (i32, i32) {
    %c0_i32 = arith.constant 0 : i32
    %c0_i32_0 = arith.constant 0 : i32
    %c0_i32_1 = arith.constant 0 : i32
    return %c0_i32, %c0_i32_0 : i32, i32
  }
  func.func @transform_8(%arg0: i32, %arg1: i32) -> (i32, i32) {
    %c0_i32 = arith.constant 0 : i32
    %c0_i32_0 = arith.constant 0 : i32
    %c0_i32_1 = arith.constant 0 : i32
    return %c0_i32, %c0_i32_0 : i32, i32
  }
  func.func @transform_9(%arg0: i32, %arg1: i32) -> (i32, i32, i32, i32) {
    %c0_i32 = arith.constant 0 : i32
    %c0_i32_0 = arith.constant 0 : i32
    %c0_i32_1 = arith.constant 0 : i32
    return %arg0, %arg1, %c0_i32, %c0_i32_0 : i32, i32, i32, i32
  }
}

</mosaic_0001>

<bundles_post_ra>
// kernel: tpu_custom_call.1
= control target key start
LH: loop header
LB: loop body
LE: loop exit
PB: predicated region body
PF: predicated region fallthrough
CT: control target
= control target key end

     0   :  { %s1554_s0 = inlined_call_operand.vmem [shape: f32[2,8,32], index: 0, kind: input, shape index: {}]   ;;  %s1555_s1 = inlined_call_operand.vmem [shape: f32[32,128], index: 1, kind: input, shape index: {}]   ;;  %s1556_s2 = inlined_call_operand.vmem [shape: f32[1,128], index: 2, kind: input, shape index: {}]   ;;  %s1557_s3 = inlined_call_operand.vmem [shape: f32[1,128], index: 3, kind: input, shape index: {}]   ;;  %s1558_s4 = inlined_call_operand.vmem [shape: f32[1,128], index: 4, kind: input, shape index: {}]   ;;  %s1559_s5 = inlined_call_operand.hbm [shape: f32[128,128], index: 5, kind: input, shape index: {}]   ;;  %s1560_s6 = inlined_call_operand.vmem [shape: f32[1,128], index: 6, kind: input, shape index: {}]   ;;  %s1561_s7 = inlined_call_operand.vmem [shape: bf16[128,16], index: 7, kind: input, shape index: {}]   ;;  %s1562_s8 = inlined_call_operand.vmem [shape: f32[1,16], index: 8, kind: input, shape index: {}]   ;;  %s1563_s9 = inlined_call_operand.hbm [shape: f32[2,8,8,16], index: 9, kind: output, shape index: {}]  }
   0x1   :  { %1564 = sst [smem:[#allocation9_spill]] %s1559_s5 }
   0x2   :  { %14 = vsyncpa [#allocation4], 0 }
   0x3   :  { %15 = vsyncpa [#allocation5], 0 }
   0x4   :  { %17 = vsyncpa [#allocation5 + $0x1], 0  ;;  %s1330_s30 = smov 0   ;;  %s1332_s10 = smov 0  }
   0x5   :  { %s1334_s11 = smov 0   ;;  %s1336_s12 = smov 0  }
   0x6   :  { %s1338_s13 = smov 0   ;;  %s1340_s14 = smov 0  }
   0x7 LB: > { %s947_s15 = sadd.s32 4294967295, %s1269_s14   ;;  %s948_s16 = sadd.s32 4294967294, %s1269_s14   ;;  %s1269_s14 = sphi %s1340_s14, %s23_s14   ;;  %s1265_s13 = sphi %s1338_s13, %s1574_s13   ;;  %s1261_s12 = sphi %s1336_s12, %s1573_s12   ;;  %s1257_s11 = sphi %s1334_s11, %s1572_s11   ;;  %s1253_s10 = sphi %s1332_s10, %s1571_s10   ;;  %s1249_s30 = sphi %s1330_s30, %s1570_s30  }
   0x8   : > { %s35_s17 = sadd.s32 1, %s1265_s13  ;;  %s238_s18 = sadd.s32 1, %s1257_s11 }
   0x9   : > { %p37_p0 = scmp.ge.s32.totalorder %s35_s17, 2  ;;  %p248_p1 = scmp.ne.s32.totalorder %s1257_s11, %s1253_s10 }
   0xa   : > { %p249_p2 = scmp.eq.s32.totalorder %s947_s15, 1  ;;  %p254_p3 = scmp.ne.s32.totalorder %s1253_s10, %s1249_s30 }
   0xb   : > { %s1576_s17 = smov (%p37_p0, %s35_s17), 0  ;;  %p255_p5 = scmp.eq.s32.totalorder %s948_s16, 1 }
   0xc   : > { %p1370_p4 = por %p249_p2, %p248_p1  ;;  %s233_s20 = ssub.s32 %s1265_s13, %s1576_s17 }
   0xd   : > { %p949_p6 = scmp.ge.s32.totalorder %s1269_s14, 1  ;;  %p236_p7 = scmp.eq.s32.totalorder %s233_s20, 0 }
   0xe   : > { %p1377_p8 = por %p255_p5, %p254_p3  ;;  %p262_p9 = scmp.lt.s32.totalorder %s1269_s14, 3 }
   0xf   : > { %s1383_s22 = scalar_select %p236_p7, %s1257_s11, %s238_s18  }
  0x10   : > { %p1385_p10 = pnand %p949_p6, %p262_p9  ;;  %p1389_p11 = scmp.eq.s32.totalorder %s947_s15, 0 }
  0x11   : > { %s1271_s25 = smov [#allocation3]  }
  0x12   : > { %p1086_p12 = pneg %p1385_p10  ;;  %s286_s26 = sshll.u32 %s1271_s25, 4  ;;  %s287_s26 = int_to_ptr.vmem [resolvable:$true] %s286_s26 }
  0x13   : > { %s1174_s27 = scalar_lea.vmem %s287_s26, 2048  ;;  %p1182_p5 = scmp.lt.s32.totalorder %s287_s26, %s287_s26 }
  0x14   : > { %p1087_p13 = pnand %p1389_p11, %p1086_p12  ;;  %p1175_p1 = scmp.ne.s32.totalorder %s287_s26, %s1174_s27 }
  0x15   : > { %p1183_p6 = scmp.lt.s32.totalorder %s1174_s27, %s1174_s27 }
  0x16   : > { %p1165_p0 = pneg %p1087_p13 }
  0x17   : > { %p1184_p7 = por %p1183_p6, %p1182_p5 }
  0x18   : > { %p1177_p2 = pnand %p1175_p1, %p1165_p0 }
  0x1a   : > { %p1178_p3 = pneg %p1177_p2 }
  0x1c   : > { %p1185_p9 = pnand %p1184_p7, %p1178_p3 }
  0x1e   : > { %1188 = shalt.err (!%p1185_p9)
}
  0x1f   : > { %s1272_s28 = smov 128   ;;  %s1273_s29 = smov 8  }
  0x20   : > { %s1569_s5 = sld [smem:[#allocation9_spill]] }
  0x22   : > { %318 = sbr.rel (%p1385_p10) target bundleno = 987 (0x3db), region = 56 }
  0x26   : > { %1089 = dma.hbm_to_vmem [thread:$0]  (!%p1087_p13), %s1569_s5, 2048, %s287_s26, [#allocation4], %s1272_s28, %s1272_s28, %s1273_s29  }
  0x27   : > { %1240 = dma.done.wait (%p1389_p11), [#allocation4], 2048  }
  0x28   : > { %1242 = vsyncadd (%p1389_p11), [#allocation4], 4294965248  ;;  %p353_p12 = scmp.lt.s32.totalorder %s1261_s12, 1  ;;  %v1274_v0 = vmov 0.0   ;;  %vm1275_vm0 = vmmov 0   ;;  %v367_v1 = vld [vmem:[%s1555_s1 + $0x18] sm:$0xff]  ;;  %v449_v13 = vlaneseq }
  0x29   : > { %1010 = vmatprep.subr.mxu1 %v1274_v0  ;;  %1018 = vmatprep.mubr.msk.f32.mxu1 %vm1275_vm0, %v1274_v0  ;;  %v366_v2 = vld [vmem:[%s1555_s1 + $0x10] sm:$0xff]  ;;  %v365_v3 = vld [vmem:[%s1555_s1 + $0x8] sm:$0xff]  ;;  %vm375_vm1 = vcmask 261120   ;;  %v364_v4 = vld [vmem:[%s1555_s1] sm:$0xff]  ;;  %v1276_v51 = vmov 1966171168  }
  0x2a   : > { %s354_s18 = scalar_select %p353_p12, %s1261_s12, 1  ;;  %1011 = vmatpush3.msra.mxu1 %v367_v1  ;;  %v956_v6 = vld [vmem:[%s1556_s2] ss:$0 sm:$0xff]  ;;  %v498_v10 = vld [vmem:[#allocation3 + $0x78] sm:$0xff]  ;;  %v497_v11 = vld [vmem:[#allocation3 + $0x70] sm:$0xff]  ;;  %v450_v14 = vand.u32 127, %v449_v13  ;;  %v577_v52 = vunpack.c.l.s4 %v1276_v51 }
  0x2b   : > { %1012 = vmatprep.subr.mxu1 %v1274_v0  ;;  %v496_v12 = vld [vmem:[#allocation3 + $0x68] sm:$0xff]  ;;  %v495_v20 = vld [vmem:[#allocation3 + $0x60] sm:$0xff]  ;;  %v494_v21 = vld [vmem:[#allocation3 + $0x58] sm:$0xff]  ;;  %v580_v54 = vshrl.u32 %v449_v13, 7  ;;  %vm835_vm3 = vcmask 130048   ;;  %s975_s27 = sshll.u32 %s1261_s12, 10 }
  0x2c   : > { %s955_s20 = sshll.u32 %s354_s18, 3  ;;  %1013 = vmatpush3.msra.mxu1 %v366_v2  ;;  %vm451_vm2 = vcmp.lt.s32.totalorder %v450_v14, 32  ;;  %v493_v22 = vld [vmem:[#allocation3 + $0x50] sm:$0xff]  ;;  %v492_v23 = vld [vmem:[#allocation3 + $0x48] sm:$0xff]  ;;  %v491_v24 = vld [vmem:[#allocation3 + $0x40] sm:$0xff]  ;;  %v578_v53 = vunpack.c.0.s8 %v577_v52  ;;  %s1501_s15 = scalar_lea.hbm %s1563_s9, %s975_s27 }
  0x2d   : > { %s356_s29 = scalar_lea.vmem %s1554_s0, %s955_s20  ;;  %1014 = vmatprep.subr.mxu1 %v1274_v0  ;;  %v490_v25 = vld [vmem:[#allocation3 + $0x38] sm:$0xff]  ;;  %v489_v26 = vld [vmem:[#allocation3 + $0x30] sm:$0xff]  ;;  %v488_v27 = vld [vmem:[#allocation3 + $0x28] sm:$0xff]  ;;  %v626_v57 = vsub.s32 0, %v580_v54  ;;  %s350_s20 = sand.u32 1, %s1253_s10  }
  0x2e   : > { %v363_v5 = vld [vmem:[%s356_s29] sm:$0xff]  ;;  %1015 = vmatpush3.msra.mxu1 %v365_v3  ;;  %v486_v29 = vld [vmem:[#allocation3 + $0x18] sm:$0xff]  ;;  %v485_v30 = vld [vmem:[#allocation3 + $0x10] sm:$0xff]  ;;  %v581_v55 = vsub.s32 %v578_v53, %v580_v54  ;;  %s954_s23 = sshll.u32 %s350_s20, 6  ;;  %s1509_s12 = scalar_lea.sflag [#allocation5], %s350_s20 }
  0x2f   : > { %1016 = vmatprep.subr.mxu1 %v1274_v0  ;;  %v487_v28 = vld [vmem:[#allocation3 + $0x20] sm:$0xff]  ;;  %v484_v31 = vld [vmem:[#allocation3 + $0x8] sm:$0xff]  ;;  %v1153_v33 = vld [vmem:[%s1561_s7 + $0x38] sm:$0xff]   ;;  %s352_s26 = scalar_lea.vmem [#allocation6], %s954_s23  ;;  %s1277_s18 = smov [#allocation6]  }
  0x30   : > { %1017 = vmatpush3.msra.mxu1 %v364_v4  ;;  %v483_v32 = vld [vmem:[#allocation3] sm:$0xff]  ;;  %v1154_v34 = vld [vmem:[%s1561_s7 + $0x30] sm:$0xff]   ;;  %1056 = vmatprep.subr.bf16.mxu0 %v1153_v33  ;;  %v1155_v35 = vld [vmem:[%s1561_s7 + $0x28] sm:$0xff]   ;;  %s860_s24 = sshll.u32 %s352_s26, 4  ;;  %s1193_s23 = sshll.u32 %s1277_s18, 4  ;;  %s1503_s24 = int_to_ptr.vmem [resolvable:$true] %s860_s24  ;;  %s1194_s23 = int_to_ptr.vmem [resolvable:$false] %s1193_s23 }
  0x31   : > { %1019 = vmatmul.mubr.msk.f32.vlgmr.msra.gmra.mxu1 %vm375_vm1, %v363_v5  ;;  %1021 = vmatprep.subr.mxu1 %v1274_v0  ;;  %v1156_v36 = vld [vmem:[%s1561_s7 + $0x20] sm:$0xff]   ;;  %v1157_v47 = vld [vmem:[%s1561_s7 + $0x18] sm:$0xff]   ;;  %v1158_v48 = vld [vmem:[%s1561_s7 + $0x10] sm:$0xff]   ;;  %s1189_s16 = scalar_lea.vmem %s1503_s24, 1024  ;;  %s1195_s5 = scalar_lea.vmem %s1194_s23, 2048 }
  0x32   : > { %1053 = vmatprep.mubr.msk.f32.mxu1 %vm1275_vm0, %v1274_v0  ;;  %1022 = vmatpush3.msra.mxu1 %v498_v10  ;;  %v958_v41 = vld [vmem:[%s1557_s3] ss:$0 sm:$0xff]  ;;  %v1159_v49 = vld [vmem:[%s1561_s7 + $0x8] sm:$0xff]   ;;  %p1190_p10 = scmp.ne.s32.totalorder %s1503_s24, %s1189_s16  ;;  %p1196_p0 = scmp.lt.s32.totalorder %s1503_s24, %s1194_s23 }
  0x33   : > { %1023 = vmatprep.subr.mxu1 %v1274_v0  ;;  %1057 = vmatpush3.bf16.msra.mxu0 %v1153_v33  ;;  %v959_v43 = vld [vmem:[%s1558_s4] ss:$0 sm:$0xff]  ;;  %p1197_p1 = scmp.lt.s32.totalorder %s1195_s5, %s1189_s16 }
  0x34   : > { %1024 = vmatpush3.msra.mxu1 %v497_v11  ;;  %1058 = vmatprep.subr.bf16.mxu0 %v1154_v34  ;;  %v1160_v50 = vld [vmem:[%s1561_s7] sm:$0xff]   ;;  %p1191_p11 = pnand %p1190_p10, %p1370_p4 }
  0x35   : > { %1025 = vmatprep.subr.mxu1 %v1274_v0  ;;  %v960_v4 = vld [vmem:[%s1560_s6] ss:$0 sm:$0xff]  ;;  %p1198_p2 = por %p1197_p1, %p1196_p0 }
  0x36   : > { %1026 = vmatpush3.msra.mxu1 %v496_v12  ;;  %p1192_p13 = pneg %p1191_p11 }
  0x37   : > { %1027 = vmatprep.subr.mxu1 %v1274_v0  ;;  %1059 = vmatpush3.bf16.msra.mxu0 %v1154_v34 }
  0x38   : > { %1028 = vmatpush3.msra.mxu1 %v495_v20  ;;  %1060 = vmatprep.subr.bf16.mxu0 %v1155_v35  ;;  %p1199_p3 = pnand %p1198_p2, %p1192_p13 }
  0x39   : > { %1029 = vmatprep.subr.mxu1 %v1274_v0 }
  0x3a   : > { %1030 = vmatpush3.msra.mxu1 %v494_v21 }
  0x3b   : > { %1031 = vmatprep.subr.mxu1 %v1274_v0  ;;  %1061 = vmatpush3.bf16.msra.mxu0 %v1155_v35 }
  0x3c   : > { %1032 = vmatpush3.msra.mxu1 %v493_v22  ;;  %1062 = vmatprep.subr.bf16.mxu0 %v1156_v36 }
  0x3d   : > { %1033 = vmatprep.subr.mxu1 %v1274_v0 }
  0x3e   : > { %1034 = vmatpush3.msra.mxu1 %v492_v23 }
  0x3f   : > { %1035 = vmatprep.subr.mxu1 %v1274_v0  ;;  %1063 = vmatpush3.bf16.msra.mxu0 %v1156_v36 }
  0x40   : > { %1036 = vmatpush3.msra.mxu1 %v491_v24  ;;  %1064 = vmatprep.subr.bf16.mxu0 %v1157_v47 }
  0x41   : > { %1037 = vmatprep.subr.mxu1 %v1274_v0 }
  0x42   : > { %1038 = vmatpush3.msra.mxu1 %v490_v25 }
  0x43   : > { %1039 = vmatprep.subr.mxu1 %v1274_v0  ;;  %1065 = vmatpush3.bf16.msra.mxu0 %v1157_v47 }
  0x44   : > { %1040 = vmatpush3.msra.mxu1 %v489_v26  ;;  %1066 = vmatprep.subr.bf16.mxu0 %v1158_v48 }
  0x45   : > { %1041 = vmatprep.subr.mxu1 %v1274_v0 }
  0x46   : > { %1042 = vmatpush3.msra.mxu1 %v488_v27 }
  0x47   : > { %1043 = vmatprep.subr.mxu1 %v1274_v0  ;;  %1067 = vmatpush3.bf16.msra.mxu0 %v1158_v48 }
  0x48   : > { %1044 = vmatpush3.msra.mxu1 %v487_v28  ;;  %1068 = vmatprep.subr.bf16.mxu0 %v1159_v49 }
  0x49   : > { %1045 = vmatprep.subr.mxu1 %v1274_v0 }
  0x4a   : > { %1046 = vmatpush3.msra.mxu1 %v486_v29 }
  0x4b   : > { %1047 = vmatprep.subr.mxu1 %v1274_v0  ;;  %1069 = vmatpush3.bf16.msra.mxu0 %v1159_v49 }
  0x4c   : > { %1048 = vmatpush3.msra.mxu1 %v485_v30  ;;  %1070 = vmatprep.subr.bf16.mxu0 %v1160_v50 }
  0x4d   : > { %1049 = vmatprep.subr.mxu1 %v1274_v0 }
  0x4e   : > { %1050 = vmatpush3.msra.mxu1 %v484_v31 }
  0x4f   : > { %1051 = vmatprep.subr.mxu1 %v1274_v0  ;;  %1071 = vmatpush3.bf16.msra.mxu0 %v1160_v50 }
  0x50   : > { %1052 = vmatpush3.msra.mxu1 %v483_v32 }
  0xf1   : > { %v445_v7 = vpop.f32.mrf.mxu1 }
  0xf2   : > { %v446_v8 = vadd.f32 %v956_v6, %v445_v7 }
  0xf3   : > { %v1020_v9 = vpop.f32.mrf.mxu1 }
  0xf4   : > { %452 = vadd.xlane.f32.xlu0 %v446_v8 }
 0x17d   : > { %v453_v15 = vpop.xlane.xlu0 %452 }
 0x17e   : > { %v454_v16 = vmul.f32 0.03125, %v453_v15 }
 0x180   : > { %v455_v17 = vsub.f32 %v446_v8, %v454_v16 }
 0x182   : > { %v458_v18 = vsel %vm451_vm2, %v455_v17, 0.0 }
 0x183   : > { %v459_v19 = vmul.f32 %v458_v18, %v458_v18 }
 0x185   : > { %460 = vadd.xlane.f32.xlu0 %v459_v19 }
 0x20e   : > { %v461_v37 = vpop.xlane.xlu0 %460 }
 0x20f   : > { %v462_v38 = vmul.f32 0.03125, %v461_v37 }
 0x211   : > { %v463_v39 = vadd.f32 1e-05, %v462_v38 }
 0x213   : > { %1161 = vrsqrt.f32 %v463_v39 }
 0x220   : > { %v1162_v40 = vpop.eup %1161 }
 0x221   : > { %v465_v42 = vmul.f32 %v1162_v40, %v458_v18 }
 0x223   : > { %v473_v44 = vmul.f32 %v958_v41, %v465_v42 }
 0x225   : > { %v481_v45 = vadd.f32 %v959_v43, %v473_v44 }
 0x227   : > { %v482_v46 = vmax.f32 %v481_v45, 0.0  ;;  %v961_v45 = vld [vmem:[%s1562_s8] ss:$0 sm:$0xff] }
 0x229   : > { %1054 = vmatmul.mubr.f32.vlgmr.msra.gmra.mxu1 %v482_v46 }
 0x2e9   : > { %v565_v56 = vpop.f32.mrf.mxu1 }
 0x2ea   : > { %v582_v58 = vrot.slane %v565_v56, %v581_v55  ;;  %v575_v59 = vcombine.high %v565_v56, %v565_v56 }
 0x2eb   : > { %v1055_v60 = vpop.f32.mrf.mxu1 }
 0x2ec   : > { %v590_v61 = vcombine.high %v582_v58, %v582_v58  ;;  %v598_v62 = vrot.slane %v582_v58, %v581_v55  ;;  %v589_v63 = vrot.slane %v575_v59, %v581_v55 }
 0x2ee   : > { %v612_v0 = vrot.slane %v590_v61, %v581_v55  ;;  %v620_v1 = vcombine.high %v598_v62, %v598_v62  ;;  %v627_v2 = vrot.slane %v598_v62, %v626_v57  ;;  %v591_v3 = vcombine.high %v589_v63, %v589_v63 }
 0x2ef   : > { %v605_v5 = vrot.slane %v589_v63, %v581_v55 }
 0x2f0   : > { %v622_v6 = vcombine.high %v612_v0, %v612_v0  ;;  %v631_v7 = vrot.slane %v612_v0, %v626_v57  ;;  %v664_v8 = vsub.f32 %v565_v56, %v627_v2  ;;  %v635_v9 = vrot.slane %v620_v1, %v626_v57 }
 0x2f1   : > { %v619_v10 = vrot.slane %v591_v3, %v581_v55  ;;  %v643_v11 = vrot.slane %v605_v5, %v626_v57  ;;  %v621_v12 = vcombine.high %v605_v5, %v605_v5 }
 0x2f2   : > { %v665_v13 = vsub.f32 %v565_v56, %v631_v7  ;;  %v679_v14 = vadd.f32 %v960_v4, %v664_v8  ;;  %v639_v15 = vrot.slane %v622_v6, %v626_v57  ;;  %v666_v16 = vsub.f32 %v565_v56, %v635_v9 }
 0x2f3   : > { %v647_v17 = vrot.slane %v619_v10, %v626_v57  ;;  %v668_v18 = vsub.f32 %v565_v56, %v643_v11  ;;  %v623_v19 = vcombine.high %v619_v10, %v619_v10  ;;  %v651_v23 = vrot.slane %v621_v12, %v626_v57 }
 0x2f4   : > { %v680_v20 = vadd.f32 %v960_v4, %v665_v13  ;;  %v667_v21 = vsub.f32 %v565_v56, %v639_v15  ;;  %v681_v22 = vadd.f32 %v960_v4, %v666_v16  ;;  %v687_v27 = vmax.f32 %v679_v14, 0.0 }
 0x2f5   : > { %v669_v24 = vsub.f32 %v565_v56, %v647_v17  ;;  %v683_v25 = vadd.f32 %v960_v4, %v668_v18  ;;  %v655_v26 = vrot.slane %v623_v19, %v626_v57  ;;  %v670_v35 = vsub.f32 %v565_v56, %v651_v23 }
 0x2f6   : > { %v688_v28 = vmax.f32 %v680_v20, 0.0  ;;  %v682_v29 = vadd.f32 %v960_v4, %v667_v21  ;;  %v689_v33 = vmax.f32 %v681_v22, 0.0 }
 0x2f7   : > { %v684_v30 = vadd.f32 %v960_v4, %v669_v24  ;;  %v671_v31 = vsub.f32 %v565_v56, %v655_v26  ;;  %v691_v36 = vmax.f32 %v683_v25, 0.0  ;;  %v685_v41 = vadd.f32 %v960_v4, %v670_v35 }
 0x2f8   : > { %v695_v32 = vpack.c.bf16 %v688_v28, %v687_v27  ;;  %v690_v34 = vmax.f32 %v682_v29, 0.0 }
 0x2f9   : > { %v692_v37 = vmax.f32 %v684_v30, 0.0  ;;  %v686_v39 = vadd.f32 %v960_v4, %v671_v31  ;;  %v693_v43 = vmax.f32 %v685_v41, 0.0 }
 0x2fa   : > { %1072 = vmatprep.mubr.bf16.mxu0 %v695_v32  ;;  %v696_v38 = vpack.c.bf16 %v690_v34, %v689_v33 }
 0x2fb   : > { %v697_v40 = vpack.c.bf16 %v692_v37, %v691_v36  ;;  %v694_v42 = vmax.f32 %v686_v39, 0.0 }
 0x2fc   : > { %1073 = vmatmul.mubr.bf16.vlgmr.msra.gmra.mxu0 %v696_v38 }
 0x2fd   : > { %1076 = vmatprep.mubr.bf16.mxu0 %v697_v40  ;;  %v698_v44 = vpack.c.bf16 %v694_v42, %v693_v43 }
 0x304   : > { %1077 = vmatmul.mubr.bf16.gmra.mxu0 %v698_v44 }
 0x3bc   : > { %v1074_v46 = vpop.f32.mrf.mxu0 }
 0x3bd   : > { %v813_v47 = vadd.f32 %v1074_v46, %v961_v45 }
 0x3be   : > { %v804_v48 = vpop.f32.mrf.mxu0 }
 0x3bf   : > { %838 = vst.msk [vmem:[%s352_s26 + $0x10] sm:$0xff] %vm835_vm3, %v813_v47  ;;  %v805_v49 = vadd.f32 %v961_v45, %v804_v48 }
 0x3c0   : > { %v1075_v50 = vpop.f32.mrf.mxu0 }
 0x3c1   : > { %836 = vst.msk [vmem:[%s352_s26] sm:$0xff] %vm835_vm3, %v805_v49  ;;  %v816_v51 = vadd.f32 %v1075_v50, %v961_v45 }
 0x3c2   : > { %v807_v52 = vpop.f32.mrf.mxu0 }
 0x3c3   : > { %839 = vst.msk [vmem:[%s352_s26 + $0x18] sm:$0xff] %vm835_vm3, %v816_v51  ;;  %v808_v53 = vadd.f32 %v961_v45, %v807_v52 }
 0x3c4   : > { %v1078_v54 = vpop.f32.mrf.mxu0 }
 0x3c5   : > { %837 = vst.msk [vmem:[%s352_s26 + $0x8] sm:$0xff] %vm835_vm3, %v808_v53  ;;  %v829_v55 = vadd.f32 %v1078_v54, %v961_v45 }
 0x3c6   : > { %v820_v56 = vpop.f32.mrf.mxu0 }
 0x3c7   : > { %842 = vst.msk [vmem:[%s352_s26 + $0x30] sm:$0xff] %vm835_vm3, %v829_v55  ;;  %v821_v57 = vadd.f32 %v961_v45, %v820_v56 }
 0x3c8   : > { %v1079_v58 = vpop.f32.mrf.mxu0 }
 0x3c9   : > { %840 = vst.msk [vmem:[%s352_s26 + $0x20] sm:$0xff] %vm835_vm3, %v821_v57  ;;  %v832_v59 = vadd.f32 %v1079_v58, %v961_v45 }
 0x3ca   : > { %v823_v60 = vpop.f32.mrf.mxu0 }
 0x3cb   : > { %843 = vst.msk [vmem:[%s352_s26 + $0x38] sm:$0xff] %vm835_vm3, %v832_v59  ;;  %v824_v61 = vadd.f32 %v961_v45, %v823_v60 }
 0x3cd   : > { %841 = vst.msk [vmem:[%s352_s26 + $0x28] sm:$0xff] %vm835_vm3, %v824_v61 }
 0x3ce   : > { %1202 = shalt.err (!%p1199_p3)
}
 0x3cf   : > { %s1203_s20 = scalar_lea.hbm %s1501_s15, 1024  ;;  %s1207_s27 = scalar_lea.hbm %s1563_s9, 2048 }
 0x3d0   : > { %p1204_p5 = scmp.ne.s32.totalorder %s1501_s15, %s1203_s20  ;;  %p1208_p9 = scmp.lt.s32.totalorder %s1501_s15, %s1563_s9 }
 0x3d1   : > { %p1209_p12 = scmp.lt.s32.totalorder %s1207_s27, %s1203_s20 }
 0x3d2   : > { %p1205_p6 = pnand %p1204_p5, %p1370_p4 }
 0x3d3   : > { %p1210_p10 = por %p1209_p12, %p1208_p9 }
 0x3d4   : > { %p1206_p7 = pneg %p1205_p6 }
 0x3d6   : > { %p1211_p11 = pnand %p1210_p10, %p1206_p7 }
 0x3d8   : > { %1214 = shalt.err (!%p1211_p11)
}
 0x3d9   : > { %s1278_s16 = smov 128   ;;  %s1279_s18 = smov 8  }
 0x3da   : > { %1084 = dma.vmem_to_hbm [thread:$0]  (%p1370_p4), %s1503_s24, 1024, %s1501_s15, %s1509_s12, %s1278_s16, %s1278_s16, %s1279_s18  }
 0x3db PF: > { %p1096_p13 = scmp.ge.s32.totalorder %s1269_s14, 2  ;;  %s875_s23 = sand.u32 1, %s1249_s30  }
 0x3dc   : > { %s876_s5 = scalar_lea.sflag [#allocation5], %s875_s23 }
 0x3dd   : > { %p1091_p0 = pnand %p1096_p13, %p1377_p8 }
 0x3df   : > { %p1092_p1 = pneg %p1091_p0 }
 0x3e1   : > { %1244 = dma.done.wait (%p1092_p1), %s876_s5, 1024  }
 0x3e2   : > { %1246 = vsyncadd (%p1092_p1), %s876_s5, 4294966272  ;;  %s23_s14 = sadd.s32 1, %s1269_s14   ;;  %s1570_s30 = smov %s1253_s10 }
 0x3e3   : > { %p20_p2 = scmp.ge.s32.totalorder %s23_s14, 4   ;;  %s1571_s10 = smov %s1257_s11 }
 0x3e4   : > { %s1572_s11 = smov %s1383_s22  ;;  %s1573_s12 = smov %s1265_s13 }
 0x3e5   : > { %s1574_s13 = smov %s1576_s17  ;;  %22 = sbr.rel (!%p20_p2) target bundleno = 7 (0x7), region = 101 }
 0x3ea   :  { %881 = vsyncpa [#allocation4], 1 }
 0x3eb   :  { %883 = vsyncpa [#allocation4 + $0x1], 1 }
 0x3ec   :  { %884 = vsyncpa [#allocation5], 1 }
 0x3ed   :  { %886 = vsyncpa [#allocation5 + $0x1], 1 }

// kernel: tpu_custom_call.1
= control target key start
LH: loop header
LB: loop body
LE: loop exit
PB: predicated region body
PF: predicated region fallthrough
CT: control target
= control target key end

     0   :  { %s1554_s0 = inlined_call_operand.vmem [shape: f32[2,8,32], index: 0, kind: input, shape index: {}]   ;;  %s1555_s1 = inlined_call_operand.vmem [shape: f32[32,128], index: 1, kind: input, shape index: {}]   ;;  %s1556_s2 = inlined_call_operand.vmem [shape: f32[1,128], index: 2, kind: input, shape index: {}]   ;;  %s1557_s3 = inlined_call_operand.vmem [shape: f32[1,128], index: 3, kind: input, shape index: {}]   ;;  %s1558_s4 = inlined_call_operand.vmem [shape: f32[1,128], index: 4, kind: input, shape index: {}]   ;;  %s1559_s5 = inlined_call_operand.hbm [shape: f32[128,128], index: 5, kind: input, shape index: {}]   ;;  %s1560_s6 = inlined_call_operand.vmem [shape: f32[1,128], index: 6, kind: input, shape index: {}]   ;;  %s1561_s7 = inlined_call_operand.vmem [shape: bf16[128,16], index: 7, kind: input, shape index: {}]   ;;  %s1562_s8 = inlined_call_operand.vmem [shape: f32[1,16], index: 8, kind: input, shape index: {}]   ;;  %s1563_s9 = inlined_call_operand.hbm [shape: f32[2,8,8,16], index: 9, kind: output, shape index: {}]  }
   0x1   :  { %1564 = sst [smem:[#allocation9_spill]] %s1559_s5 }
   0x2   :  { %14 = vsyncpa [#allocation4], 0 }
   0x3   :  { %15 = vsyncpa [#allocation5], 0 }
   0x4   :  { %17 = vsyncpa [#allocation5 + $0x1], 0  ;;  %s1330_s30 = smov 0   ;;  %s1332_s10 = smov 0  }
   0x5   :  { %s1334_s11 = smov 0   ;;  %s1336_s12 = smov 0  }
   0x6   :  { %s1338_s13 = smov 0   ;;  %s1340_s14 = smov 0  }
   0x7 LB: > { %s947_s15 = sadd.s32 4294967295, %s1269_s14   ;;  %s948_s16 = sadd.s32 4294967294, %s1269_s14   ;;  %s1269_s14 = sphi %s1340_s14, %s23_s14   ;;  %s1265_s13 = sphi %s1338_s13, %s1574_s13   ;;  %s1261_s12 = sphi %s1336_s12, %s1573_s12   ;;  %s1257_s11 = sphi %s1334_s11, %s1572_s11   ;;  %s1253_s10 = sphi %s1332_s10, %s1571_s10   ;;  %s1249_s30 = sphi %s1330_s30, %s1570_s30  }
   0x8   : > { %s35_s17 = sadd.s32 1, %s1265_s13  ;;  %s238_s18 = sadd.s32 1, %s1257_s11 }
   0x9   : > { %p37_p0 = scmp.ge.s32.totalorder %s35_s17, 2  ;;  %p248_p1 = scmp.ne.s32.totalorder %s1257_s11, %s1253_s10 }
   0xa   : > { %p249_p2 = scmp.eq.s32.totalorder %s947_s15, 1  ;;  %p254_p3 = scmp.ne.s32.totalorder %s1253_s10, %s1249_s30 }
   0xb   : > { %s1576_s17 = smov (%p37_p0, %s35_s17), 0  ;;  %p255_p5 = scmp.eq.s32.totalorder %s948_s16, 1 }
   0xc   : > { %p1370_p4 = por %p249_p2, %p248_p1  ;;  %s233_s20 = ssub.s32 %s1265_s13, %s1576_s17 }
   0xd   : > { %p949_p6 = scmp.ge.s32.totalorder %s1269_s14, 1  ;;  %p236_p7 = scmp.eq.s32.totalorder %s233_s20, 0 }
   0xe   : > { %p1377_p8 = por %p255_p5, %p254_p3  ;;  %p262_p9 = scmp.lt.s32.totalorder %s1269_s14, 3 }
   0xf   : > { %s1383_s22 = scalar_select %p236_p7, %s1257_s11, %s238_s18  }
  0x10   : > { %p1385_p10 = pnand %p949_p6, %p262_p9  ;;  %p1389_p11 = scmp.eq.s32.totalorder %s947_s15, 0 }
  0x11   : > { %s1271_s25 = smov [#allocation3]  }
  0x12   : > { %p1086_p12 = pneg %p1385_p10  ;;  %s286_s26 = sshll.u32 %s1271_s25, 4  ;;  %s287_s26 = int_to_ptr.vmem [resolvable:$true] %s286_s26 }
  0x13   : > { %s1174_s27 = scalar_lea.vmem %s287_s26, 2048  ;;  %p1182_p5 = scmp.lt.s32.totalorder %s287_s26, %s287_s26 }
  0x14   : > { %p1087_p13 = pnand %p1389_p11, %p1086_p12  ;;  %p1175_p1 = scmp.ne.s32.totalorder %s287_s26, %s1174_s27 }
  0x15   : > { %p1183_p6 = scmp.lt.s32.totalorder %s1174_s27, %s1174_s27 }
  0x16   : > { %p1165_p0 = pneg %p1087_p13 }
  0x17   : > { %p1184_p7 = por %p1183_p6, %p1182_p5 }
  0x18   : > { %p1177_p2 = pnand %p1175_p1, %p1165_p0 }
  0x1a   : > { %p1178_p3 = pneg %p1177_p2 }
  0x1c   : > { %p1185_p9 = pnand %p1184_p7, %p1178_p3 }
  0x1e   : > { %1188 = shalt.err (!%p1185_p9)
}
  0x1f   : > { %s1272_s28 = smov 128   ;;  %s1273_s29 = smov 8  }
  0x20   : > { %s1569_s5 = sld [smem:[#allocation9_spill]] }
  0x22   : > { %318 = sbr.rel (%p1385_p10) target bundleno = 987 (0x3db), region = 56 }
  0x26   : > { %1089 = dma.hbm_to_vmem [thread:$0]  (!%p1087_p13), %s1569_s5, 2048, %s287_s26, [#allocation4], %s1272_s28, %s1272_s28, %s1273_s29  }
  0x27   : > { %1240 = dma.done.wait (%p1389_p11), [#allocation4], 2048  }
  0x28   : > { %1242 = vsyncadd (%p1389_p11), [#allocation4], 4294965248  ;;  %p353_p12 = scmp.lt.s32.totalorder %s1261_s12, 1  ;;  %v1274_v0 = vmov 0.0   ;;  %vm1275_vm0 = vmmov 0   ;;  %v367_v1 = vld [vmem:[%s1555_s1 + $0x18] sm:$0xff]  ;;  %v449_v13 = vlaneseq }
  0x29   : > { %1010 = vmatprep.subr.mxu1 %v1274_v0  ;;  %1018 = vmatprep.mubr.msk.f32.mxu1 %vm1275_vm0, %v1274_v0  ;;  %v366_v2 = vld [vmem:[%s1555_s1 + $0x10] sm:$0xff]  ;;  %v365_v3 = vld [vmem:[%s1555_s1 + $0x8] sm:$0xff]  ;;  %vm375_vm1 = vcmask 261120   ;;  %v364_v4 = vld [vmem:[%s1555_s1] sm:$0xff]  ;;  %v1276_v51 = vmov 1966171168  }
  0x2a   : > { %s354_s18 = scalar_select %p353_p12, %s1261_s12, 1  ;;  %1011 = vmatpush3.msra.mxu1 %v367_v1  ;;  %v956_v6 = vld [vmem:[%s1556_s2] ss:$0 sm:$0xff]  ;;  %v498_v10 = vld [vmem:[#allocation3 + $0x78] sm:$0xff]  ;;  %v497_v11 = vld [vmem:[#allocation3 + $0x70] sm:$0xff]  ;;  %v450_v14 = vand.u32 127, %v449_v13  ;;  %v577_v52 = vunpack.c.l.s4 %v1276_v51 }
  0x2b   : > { %1012 = vmatprep.subr.mxu1 %v1274_v0  ;;  %v496_v12 = vld [vmem:[#allocation3 + $0x68] sm:$0xff]  ;;  %v495_v20 = vld [vmem:[#allocation3 + $0x60] sm:$0xff]  ;;  %v494_v21 = vld [vmem:[#allocation3 + $0x58] sm:$0xff]  ;;  %v580_v54 = vshrl.u32 %v449_v13, 7  ;;  %vm835_vm3 = vcmask 130048   ;;  %s975_s27 = sshll.u32 %s1261_s12, 10 }
  0x2c   : > { %s955_s20 = sshll.u32 %s354_s18, 3  ;;  %1013 = vmatpush3.msra.mxu1 %v366_v2  ;;  %vm451_vm2 = vcmp.lt.s32.totalorder %v450_v14, 32  ;;  %v493_v22 = vld [vmem:[#allocation3 + $0x50] sm:$0xff]  ;;  %v492_v23 = vld [vmem:[#allocation3 + $0x48] sm:$0xff]  ;;  %v491_v24 = vld [vmem:[#allocation3 + $0x40] sm:$0xff]  ;;  %v578_v53 = vunpack.c.0.s8 %v577_v52  ;;  %s1501_s15 = scalar_lea.hbm %s1563_s9, %s975_s27 }
  0x2d   : > { %s356_s29 = scalar_lea.vmem %s1554_s0, %s955_s20  ;;  %1014 = vmatprep.subr.mxu1 %v1274_v0  ;;  %v490_v25 = vld [vmem:[#allocation3 + $0x38] sm:$0xff]  ;;  %v489_v26 = vld [vmem:[#allocation3 + $0x30] sm:$0xff]  ;;  %v488_v27 = vld [vmem:[#allocation3 + $0x28] sm:$0xff]  ;;  %v626_v57 = vsub.s32 0, %v580_v54  ;;  %s350_s20 = sand.u32 1, %s1253_s10  }
  0x2e   : > { %v363_v5 = vld [vmem:[%s356_s29] sm:$0xff]  ;;  %1015 = vmatpush3.msra.mxu1 %v365_v3  ;;  %v486_v29 = vld [vmem:[#allocation3 + $0x18] sm:$0xff]  ;;  %v485_v30 = vld [vmem:[#allocation3 + $0x10] sm:$0xff]  ;;  %v581_v55 = vsub.s32 %v578_v53, %v580_v54  ;;  %s954_s23 = sshll.u32 %s350_s20, 6  ;;  %s1509_s12 = scalar_lea.sflag [#allocation5], %s350_s20 }
  0x2f   : > { %1016 = vmatprep.subr.mxu1 %v1274_v0  ;;  %v487_v28 = vld [vmem:[#allocation3 + $0x20] sm:$0xff]  ;;  %v484_v31 = vld [vmem:[#allocation3 + $0x8] sm:$0xff]  ;;  %v1153_v33 = vld [vmem:[%s1561_s7 + $0x38] sm:$0xff]   ;;  %s352_s26 = scalar_lea.vmem [#allocation6], %s954_s23  ;;  %s1277_s18 = smov [#allocation6]  }
  0x30   : > { %1017 = vmatpush3.msra.mxu1 %v364_v4  ;;  %v483_v32 = vld [vmem:[#allocation3] sm:$0xff]  ;;  %v1154_v34 = vld [vmem:[%s1561_s7 + $0x30] sm:$0xff]   ;;  %1056 = vmatprep.subr.bf16.mxu0 %v1153_v33  ;;  %v1155_v35 = vld [vmem:[%s1561_s7 + $0x28] sm:$0xff]   ;;  %s860_s24 = sshll.u32 %s352_s26, 4  ;;  %s1193_s23 = sshll.u32 %s1277_s18, 4  ;;  %s1503_s24 = int_to_ptr.vmem [resolvable:$true] %s860_s24  ;;  %s1194_s23 = int_to_ptr.vmem [resolvable:$false] %s1193_s23 }
  0x31   : > { %1019 = vmatmul.mubr.msk.f32.vlgmr.msra.gmra.mxu1 %vm375_vm1, %v363_v5  ;;  %1021 = vmatprep.subr.mxu1 %v1274_v0  ;;  %v1156_v36 = vld [vmem:[%s1561_s7 + $0x20] sm:$0xff]   ;;  %v1157_v47 = vld [vmem:[%s1561_s7 + $0x18] sm:$0xff]   ;;  %v1158_v48 = vld [vmem:[%s1561_s7 + $0x10] sm:$0xff]   ;;  %s1189_s16 = scalar_lea.vmem %s1503_s24, 1024  ;;  %s1195_s5 = scalar_lea.vmem %s1194_s23, 2048 }
  0x32   : > { %1053 = vmatprep.mubr.msk.f32.mxu1 %vm1275_vm0, %v1274_v0  ;;  %1022 = vmatpush3.msra.mxu1 %v498_v10  ;;  %v958_v41 = vld [vmem:[%s1557_s3] ss:$0 sm:$0xff]  ;;  %v1159_v49 = vld [vmem:[%s1561_s7 + $0x8] sm:$0xff]   ;;  %p1190_p10 = scmp.ne.s32.totalorder %s1503_s24, %s1189_s16  ;;  %p1196_p0 = scmp.lt.s32.totalorder %s1503_s24, %s1194_s23 }
  0x33   : > { %1023 = vmatprep.subr.mxu1 %v1274_v0  ;;  %1057 = vmatpush3.bf16.msra.mxu0 %v1153_v33  ;;  %v959_v43 = vld [vmem:[%s1558_s4] ss:$0 sm:$0xff]  ;;  %p1197_p1 = scmp.lt.s32.totalorder %s1195_s5, %s1189_s16 }
  0x34   : > { %1024 = vmatpush3.msra.mxu1 %v497_v11  ;;  %1058 = vmatprep.subr.bf16.mxu0 %v1154_v34  ;;  %v1160_v50 = vld [vmem:[%s1561_s7] sm:$0xff]   ;;  %p1191_p11 = pnand %p1190_p10, %p1370_p4 }
  0x35   : > { %1025 = vmatprep.subr.mxu1 %v1274_v0  ;;  %v960_v4 = vld [vmem:[%s1560_s6] ss:$0 sm:$0xff]  ;;  %p1198_p2 = por %p1197_p1, %p1196_p0 }
  0x36   : > { %1026 = vmatpush3.msra.mxu1 %v496_v12  ;;  %p1192_p13 = pneg %p1191_p11 }
  0x37   : > { %1027 = vmatprep.subr.mxu1 %v1274_v0  ;;  %1059 = vmatpush3.bf16.msra.mxu0 %v1154_v34 }
  0x38   : > { %1028 = vmatpush3.msra.mxu1 %v495_v20  ;;  %1060 = vmatprep.subr.bf16.mxu0 %v1155_v35  ;;  %p1199_p3 = pnand %p1198_p2, %p1192_p13 }
  0x39   : > { %1029 = vmatprep.subr.mxu1 %v1274_v0 }
  0x3a   : > { %1030 = vmatpush3.msra.mxu1 %v494_v21 }
  0x3b   : > { %1031 = vmatprep.subr.mxu1 %v1274_v0  ;;  %1061 = vmatpush3.bf16.msra.mxu0 %v1155_v35 }
  0x3c   : > { %1032 = vmatpush3.msra.mxu1 %v493_v22  ;;  %1062 = vmatprep.subr.bf16.mxu0 %v1156_v36 }
  0x3d   : > { %1033 = vmatprep.subr.mxu1 %v1274_v0 }
  0x3e   : > { %1034 = vmatpush3.msra.mxu1 %v492_v23 }
  0x3f   : > { %1035 = vmatprep.subr.mxu1 %v1274_v0  ;;  %1063 = vmatpush3.bf16.msra.mxu0 %v1156_v36 }
  0x40   : > { %1036 = vmatpush3.msra.mxu1 %v491_v24  ;;  %1064 = vmatprep.subr.bf16.mxu0 %v1157_v47 }
  0x41   : > { %1037 = vmatprep.subr.mxu1 %v1274_v0 }
  0x42   : > { %1038 = vmatpush3.msra.mxu1 %v490_v25 }
  0x43   : > { %1039 = vmatprep.subr.mxu1 %v1274_v0  ;;  %1065 = vmatpush3.bf16.msra.mxu0 %v1157_v47 }
  0x44   : > { %1040 = vmatpush3.msra.mxu1 %v489_v26  ;;  %1066 = vmatprep.subr.bf16.mxu0 %v1158_v48 }
  0x45   : > { %1041 = vmatprep.subr.mxu1 %v1274_v0 }
  0x46   : > { %1042 = vmatpush3.msra.mxu1 %v488_v27 }
  0x47   : > { %1043 = vmatprep.subr.mxu1 %v1274_v0  ;;  %1067 = vmatpush3.bf16.msra.mxu0 %v1158_v48 }
  0x48   : > { %1044 = vmatpush3.msra.mxu1 %v487_v28  ;;  %1068 = vmatprep.subr.bf16.mxu0 %v1159_v49 }
  0x49   : > { %1045 = vmatprep.subr.mxu1 %v1274_v0 }
  0x4a   : > { %1046 = vmatpush3.msra.mxu1 %v486_v29 }
  0x4b   : > { %1047 = vmatprep.subr.mxu1 %v1274_v0  ;;  %1069 = vmatpush3.bf16.msra.mxu0 %v1159_v49 }
  0x4c   : > { %1048 = vmatpush3.msra.mxu1 %v485_v30  ;;  %1070 = vmatprep.subr.bf16.mxu0 %v1160_v50 }
  0x4d   : > { %1049 = vmatprep.subr.mxu1 %v1274_v0 }
  0x4e   : > { %1050 = vmatpush3.msra.mxu1 %v484_v31 }
  0x4f   : > { %1051 = vmatprep.subr.mxu1 %v1274_v0  ;;  %1071 = vmatpush3.bf16.msra.mxu0 %v1160_v50 }
  0x50   : > { %1052 = vmatpush3.msra.mxu1 %v483_v32 }
  0xf1   : > { %v445_v7 = vpop.f32.mrf.mxu1 }
  0xf2   : > { %v446_v8 = vadd.f32 %v956_v6, %v445_v7 }
  0xf3   : > { %v1020_v9 = vpop.f32.mrf.mxu1 }
  0xf4   : > { %452 = vadd.xlane.f32.xlu0 %v446_v8 }
 0x17d   : > { %v453_v15 = vpop.xlane.xlu0 %452 }
 0x17e   : > { %v454_v16 = vmul.f32 0.03125, %v453_v15 }
 0x180   : > { %v455_v17 = vsub.f32 %v446_v8, %v454_v16 }
 0x182   : > { %v458_v18 = vsel %vm451_vm2, %v455_v17, 0.0 }
 0x183   : > { %v459_v19 = vmul.f32 %v458_v18, %v458_v18 }
 0x185   : > { %460 = vadd.xlane.f32.xlu0 %v459_v19 }
 0x20e   : > { %v461_v37 = vpop.xlane.xlu0 %460 }
 0x20f   : > { %v462_v38 = vmul.f32 0.03125, %v461_v37 }
 0x211   : > { %v463_v39 = vadd.f32 1e-05, %v462_v38 }
 0x213   : > { %1161 = vrsqrt.f32 %v463_v39 }
 0x220   : > { %v1162_v40 = vpop.eup %1161 }
 0x221   : > { %v465_v42 = vmul.f32 %v1162_v40, %v458_v18 }
 0x223   : > { %v473_v44 = vmul.f32 %v958_v41, %v465_v42 }
 0x225   : > { %v481_v45 = vadd.f32 %v959_v43, %v473_v44 }
 0x227   : > { %v482_v46 = vmax.f32 %v481_v45, 0.0  ;;  %v961_v45 = vld [vmem:[%s1562_s8] ss:$0 sm:$0xff] }
 0x229   : > { %1054 = vmatmul.mubr.f32.vlgmr.msra.gmra.mxu1 %v482_v46 }
 0x2e9   : > { %v565_v56 = vpop.f32.mrf.mxu1 }
 0x2ea   : > { %v582_v58 = vrot.slane %v565_v56, %v581_v55  ;;  %v575_v59 = vcombine.high %v565_v56, %v565_v56 }
 0x2eb   : > { %v1055_v60 = vpop.f32.mrf.mxu1 }
 0x2ec   : > { %v590_v61 = vcombine.high %v582_v58, %v582_v58  ;;  %v598_v62 = vrot.slane %v582_v58, %v581_v55  ;;  %v589_v63 = vrot.slane %v575_v59, %v581_v55 }
 0x2ee   : > { %v612_v0 = vrot.slane %v590_v61, %v581_v55  ;;  %v620_v1 = vcombine.high %v598_v62, %v598_v62  ;;  %v627_v2 = vrot.slane %v598_v62, %v626_v57  ;;  %v591_v3 = vcombine.high %v589_v63, %v589_v63 }
 0x2ef   : > { %v605_v5 = vrot.slane %v589_v63, %v581_v55 }
 0x2f0   : > { %v622_v6 = vcombine.high %v612_v0, %v612_v0  ;;  %v631_v7 = vrot.slane %v612_v0, %v626_v57  ;;  %v664_v8 = vsub.f32 %v565_v56, %v627_v2  ;;  %v635_v9 = vrot.slane %v620_v1, %v626_v57 }
 0x2f1   : > { %v619_v10 = vrot.slane %v591_v3, %v581_v55  ;;  %v643_v11 = vrot.slane %v605_v5, %v626_v57  ;;  %v621_v12 = vcombine.high %v605_v5, %v605_v5 }
 0x2f2   : > { %v665_v13 = vsub.f32 %v565_v56, %v631_v7  ;;  %v679_v14 = vadd.f32 %v960_v4, %v664_v8  ;;  %v639_v15 = vrot.slane %v622_v6, %v626_v57  ;;  %v666_v16 = vsub.f32 %v565_v56, %v635_v9 }
 0x2f3   : > { %v647_v17 = vrot.slane %v619_v10, %v626_v57  ;;  %v668_v18 = vsub.f32 %v565_v56, %v643_v11  ;;  %v623_v19 = vcombine.high %v619_v10, %v619_v10  ;;  %v651_v23 = vrot.slane %v621_v12, %v626_v57 }
 0x2f4   : > { %v680_v20 = vadd.f32 %v960_v4, %v665_v13  ;;  %v667_v21 = vsub.f32 %v565_v56, %v639_v15  ;;  %v681_v22 = vadd.f32 %v960_v4, %v666_v16  ;;  %v687_v27 = vmax.f32 %v679_v14, 0.0 }
 0x2f5   : > { %v669_v24 = vsub.f32 %v565_v56, %v647_v17  ;;  %v683_v25 = vadd.f32 %v960_v4, %v668_v18  ;;  %v655_v26 = vrot.slane %v623_v19, %v626_v57  ;;  %v670_v35 = vsub.f32 %v565_v56, %v651_v23 }
 0x2f6   : > { %v688_v28 = vmax.f32 %v680_v20, 0.0  ;;  %v682_v29 = vadd.f32 %v960_v4, %v667_v21  ;;  %v689_v33 = vmax.f32 %v681_v22, 0.0 }
 0x2f7   : > { %v684_v30 = vadd.f32 %v960_v4, %v669_v24  ;;  %v671_v31 = vsub.f32 %v565_v56, %v655_v26  ;;  %v691_v36 = vmax.f32 %v683_v25, 0.0  ;;  %v685_v41 = vadd.f32 %v960_v4, %v670_v35 }
 0x2f8   : > { %v695_v32 = vpack.c.bf16 %v688_v28, %v687_v27  ;;  %v690_v34 = vmax.f32 %v682_v29, 0.0 }
 0x2f9   : > { %v692_v37 = vmax.f32 %v684_v30, 0.0  ;;  %v686_v39 = vadd.f32 %v960_v4, %v671_v31  ;;  %v693_v43 = vmax.f32 %v685_v41, 0.0 }
 0x2fa   : > { %1072 = vmatprep.mubr.bf16.mxu0 %v695_v32  ;;  %v696_v38 = vpack.c.bf16 %v690_v34, %v689_v33 }
 0x2fb   : > { %v697_v40 = vpack.c.bf16 %v692_v37, %v691_v36  ;;  %v694_v42 = vmax.f32 %v686_v39, 0.0 }
 0x2fc   : > { %1073 = vmatmul.mubr.bf16.vlgmr.msra.gmra.mxu0 %v696_v38 }
 0x2fd   : > { %1076 = vmatprep.mubr.bf16.mxu0 %v697_v40  ;;  %v698_v44 = vpack.c.bf16 %v694_v42, %v693_v43 }
 0x304   : > { %1077 = vmatmul.mubr.bf16.gmra.mxu0 %v698_v44 }
 0x3bc   : > { %v1074_v46 = vpop.f32.mrf.mxu0 }
 0x3bd   : > { %v813_v47 = vadd.f32 %v1074_v46, %v961_v45 }
 0x3be   : > { %v804_v48 = vpop.f32.mrf.mxu0 }
 0x3bf   : > { %838 = vst.msk [vmem:[%s352_s26 + $0x10] sm:$0xff] %vm835_vm3, %v813_v47  ;;  %v805_v49 = vadd.f32 %v961_v45, %v804_v48 }
 0x3c0   : > { %v1075_v50 = vpop.f32.mrf.mxu0 }
 0x3c1   : > { %836 = vst.msk [vmem:[%s352_s26] sm:$0xff] %vm835_vm3, %v805_v49  ;;  %v816_v51 = vadd.f32 %v1075_v50, %v961_v45 }
 0x3c2   : > { %v807_v52 = vpop.f32.mrf.mxu0 }
 0x3c3   : > { %839 = vst.msk [vmem:[%s352_s26 + $0x18] sm:$0xff] %vm835_vm3, %v816_v51  ;;  %v808_v53 = vadd.f32 %v961_v45, %v807_v52 }
 0x3c4   : > { %v1078_v54 = vpop.f32.mrf.mxu0 }
 0x3c5   : > { %837 = vst.msk [vmem:[%s352_s26 + $0x8] sm:$0xff] %vm835_vm3, %v808_v53  ;;  %v829_v55 = vadd.f32 %v1078_v54, %v961_v45 }
 0x3c6   : > { %v820_v56 = vpop.f32.mrf.mxu0 }
 0x3c7   : > { %842 = vst.msk [vmem:[%s352_s26 + $0x30] sm:$0xff] %vm835_vm3, %v829_v55  ;;  %v821_v57 = vadd.f32 %v961_v45, %v820_v56 }
 0x3c8   : > { %v1079_v58 = vpop.f32.mrf.mxu0 }
 0x3c9   : > { %840 = vst.msk [vmem:[%s352_s26 + $0x20] sm:$0xff] %vm835_vm3, %v821_v57  ;;  %v832_v59 = vadd.f32 %v1079_v58, %v961_v45 }
 0x3ca   : > { %v823_v60 = vpop.f32.mrf.mxu0 }
 0x3cb   : > { %843 = vst.msk [vmem:[%s352_s26 + $0x38] sm:$0xff] %vm835_vm3, %v832_v59  ;;  %v824_v61 = vadd.f32 %v961_v45, %v823_v60 }
 0x3cd   : > { %841 = vst.msk [vmem:[%s352_s26 + $0x28] sm:$0xff] %vm835_vm3, %v824_v61 }
 0x3ce   : > { %1202 = shalt.err (!%p1199_p3)
}
 0x3cf   : > { %s1203_s20 = scalar_lea.hbm %s1501_s15, 1024  ;;  %s1207_s27 = scalar_lea.hbm %s1563_s9, 2048 }
 0x3d0   : > { %p1204_p5 = scmp.ne.s32.totalorder %s1501_s15, %s1203_s20  ;;  %p1208_p9 = scmp.lt.s32.totalorder %s1501_s15, %s1563_s9 }
 0x3d1   : > { %p1209_p12 = scmp.lt.s32.totalorder %s1207_s27, %s1203_s20 }
 0x3d2   : > { %p1205_p6 = pnand %p1204_p5, %p1370_p4 }
 0x3d3   : > { %p1210_p10 = por %p1209_p12, %p1208_p9 }
 0x3d4   : > { %p1206_p7 = pneg %p1205_p6 }
 0x3d6   : > { %p1211_p11 = pnand %p1210_p10, %p1206_p7 }
 0x3d8   : > { %1214 = shalt.err (!%p1211_p11)
}
 0x3d9   : > { %s1278_s16 = smov 128   ;;  %s1279_s18 = smov 8  }
 0x3da   : > { %1084 = dma.vmem_to_hbm [thread:$0]  (%p1370_p4), %s1503_s24, 1024, %s1501_s15, %s1509_s12, %s1278_s16, %s1278_s16, %s1279_s18  }
 0x3db PF: > { %p1096_p13 = scmp.ge.s32.totalorder %s1269_s14, 2  ;;  %s875_s23 = sand.u32 1, %s1249_s30  }
 0x3dc   : > { %s876_s5 = scalar_lea.sflag [#allocation5], %s875_s23 }
 0x3dd   : > { %p1091_p0 = pnand %p1096_p13, %p1377_p8 }
 0x3df   : > { %p1092_p1 = pneg %p1091_p0 }
 0x3e1   : > { %1244 = dma.done.wait (%p1092_p1), %s876_s5, 1024  }
 0x3e2   : > { %1246 = vsyncadd (%p1092_p1), %s876_s5, 4294966272  ;;  %s23_s14 = sadd.s32 1, %s1269_s14   ;;  %s1570_s30 = smov %s1253_s10 }
 0x3e3   : > { %p20_p2 = scmp.ge.s32.totalorder %s23_s14, 4   ;;  %s1571_s10 = smov %s1257_s11 }
 0x3e4   : > { %s1572_s11 = smov %s1383_s22  ;;  %s1573_s12 = smov %s1265_s13 }
 0x3e5   : > { %s1574_s13 = smov %s1576_s17  ;;  %22 = sbr.rel (!%p20_p2) target bundleno = 7 (0x7), region = 101 }
 0x3ea   :  { %881 = vsyncpa [#allocation4], 1 }
 0x3eb   :  { %883 = vsyncpa [#allocation4 + $0x1], 1 }
 0x3ec   :  { %884 = vsyncpa [#allocation5], 1 }
 0x3ed   :  { %886 = vsyncpa [#allocation5 + $0x1], 1 }

// kernel: tpu_custom_call.1
= control target key start
LH: loop header
LB: loop body
LE: loop exit
PB: predicated region body
PF: predicated region fallthrough
CT: control target
= control target key end

     0   :  { %s1554_s0 = inlined_call_operand.vmem [shape: f32[2,8,32], index: 0, kind: input, shape index: {}]   ;;  %s1555_s1 = inlined_call_operand.vmem [shape: f32[32,128], index: 1, kind: input, shape index: {}]   ;;  %s1556_s2 = inlined_call_operand.vmem [shape: f32[1,128], index: 2, kind: input, shape index: {}]   ;;  %s1557_s3 = inlined_call_operand.vmem [shape: f32[1,128], index: 3, kind: input, shape index: {}]   ;;  %s1558_s4 = inlined_call_operand.vmem [shape: f32[1,128], index: 4, kind: input, shape index: {}]   ;;  %s1559_s5 = inlined_call_operand.hbm [shape: f32[128,128], index: 5, kind: input, shape index: {}]   ;;  %s1560_s6 = inlined_call_operand.vmem [shape: f32[1,128], index: 6, kind: input, shape index: {}]   ;;  %s1561_s7 = inlined_call_operand.vmem [shape: bf16[128,16], index: 7, kind: input, shape index: {}]   ;;  %s1562_s8 = inlined_call_operand.vmem [shape: f32[1,16], index: 8, kind: input, shape index: {}]   ;;  %s1563_s9 = inlined_call_operand.hbm [shape: f32[2,8,8,16], index: 9, kind: output, shape index: {}]  }
   0x1   :  { %1564 = sst [smem:[#allocation9_spill]] %s1559_s5 }
   0x2   :  { %14 = vsyncpa [#allocation4], 0 }
   0x3   :  { %15 = vsyncpa [#allocation5], 0 }
   0x4   :  { %17 = vsyncpa [#allocation5 + $0x1], 0  ;;  %s1330_s30 = smov 0   ;;  %s1332_s10 = smov 0  }
   0x5   :  { %s1334_s11 = smov 0   ;;  %s1336_s12 = smov 0  }
   0x6   :  { %s1338_s13 = smov 0   ;;  %s1340_s14 = smov 0  }
   0x7 LB: > { %s947_s15 = sadd.s32 4294967295, %s1269_s14   ;;  %s948_s16 = sadd.s32 4294967294, %s1269_s14   ;;  %s1269_s14 = sphi %s1340_s14, %s23_s14   ;;  %s1265_s13 = sphi %s1338_s13, %s1574_s13   ;;  %s1261_s12 = sphi %s1336_s12, %s1573_s12   ;;  %s1257_s11 = sphi %s1334_s11, %s1572_s11   ;;  %s1253_s10 = sphi %s1332_s10, %s1571_s10   ;;  %s1249_s30 = sphi %s1330_s30, %s1570_s30  }
   0x8   : > { %s35_s17 = sadd.s32 1, %s1265_s13  ;;  %s238_s18 = sadd.s32 1, %s1257_s11 }
   0x9   : > { %p37_p0 = scmp.ge.s32.totalorder %s35_s17, 2  ;;  %p248_p1 = scmp.ne.s32.totalorder %s1257_s11, %s1253_s10 }
   0xa   : > { %p249_p2 = scmp.eq.s32.totalorder %s947_s15, 1  ;;  %p254_p3 = scmp.ne.s32.totalorder %s1253_s10, %s1249_s30 }
   0xb   : > { %s1576_s17 = smov (%p37_p0, %s35_s17), 0  ;;  %p255_p5 = scmp.eq.s32.totalorder %s948_s16, 1 }
   0xc   : > { %p1370_p4 = por %p249_p2, %p248_p1  ;;  %s233_s20 = ssub.s32 %s1265_s13, %s1576_s17 }
   0xd   : > { %p949_p6 = scmp.ge.s32.totalorder %s1269_s14, 1  ;;  %p236_p7 = scmp.eq.s32.totalorder %s233_s20, 0 }
   0xe   : > { %p1377_p8 = por %p255_p5, %p254_p3  ;;  %p262_p9 = scmp.lt.s32.totalorder %s1269_s14, 3 }
   0xf   : > { %s1383_s22 = scalar_select %p236_p7, %s1257_s11, %s238_s18  }
  0x10   : > { %p1385_p10 = pnand %p949_p6, %p262_p9  ;;  %p1389_p11 = scmp.eq.s32.totalorder %s947_s15, 0 }
  0x11   : > { %s1271_s25 = smov [#allocation3]  }
  0x12   : > { %p1086_p12 = pneg %p1385_p10  ;;  %s286_s26 = sshll.u32 %s1271_s25, 4  ;;  %s287_s26 = int_to_ptr.vmem [resolvable:$true] %s286_s26 }
  0x13   : > { %s1174_s27 = scalar_lea.vmem %s287_s26, 2048  ;;  %p1182_p5 = scmp.lt.s32.totalorder %s287_s26, %s287_s26 }
  0x14   : > { %p1087_p13 = pnand %p1389_p11, %p1086_p12  ;;  %p1175_p1 = scmp.ne.s32.totalorder %s287_s26, %s1174_s27 }
  0x15   : > { %p1183_p6 = scmp.lt.s32.totalorder %s1174_s27, %s1174_s27 }
  0x16   : > { %p1165_p0 = pneg %p1087_p13 }
  0x17   : > { %p1184_p7 = por %p1183_p6, %p1182_p5 }
  0x18   : > { %p1177_p2 = pnand %p1175_p1, %p1165_p0 }
  0x1a   : > { %p1178_p3 = pneg %p1177_p2 }
  0x1c   : > { %p1185_p9 = pnand %p1184_p7, %p1178_p3 }
  0x1e   : > { %1188 = shalt.err (!%p1185_p9)
}
  0x1f   : > { %s1272_s28 = smov 128   ;;  %s1273_s29 = smov 8  }
  0x20   : > { %s1569_s5 = sld [smem:[#allocation9_spill]] }
  0x22   : > { %318 = sbr.rel (%p1385_p10) target bundleno = 987 (0x3db), region = 56 }
  0x26   : > { %1089 = dma.hbm_to_vmem [thread:$0]  (!%p1087_p13), %s1569_s5, 2048, %s287_s26, [#allocation4], %s1272_s28, %s1272_s28, %s1273_s29  }
  0x27   : > { %1240 = dma.done.wait (%p1389_p11), [#allocation4], 2048  }
  0x28   : > { %1242 = vsyncadd (%p1389_p11), [#allocation4], 4294965248  ;;  %p353_p12 = scmp.lt.s32.totalorder %s1261_s12, 1  ;;  %v1274_v0 = vmov 0.0   ;;  %vm1275_vm0 = vmmov 0   ;;  %v367_v1 = vld [vmem:[%s1555_s1 + $0x18] sm:$0xff]  ;;  %v449_v13 = vlaneseq }
  0x29   : > { %1010 = vmatprep.subr.mxu1 %v1274_v0  ;;  %1018 = vmatprep.mubr.msk.f32.mxu1 %vm1275_vm0, %v1274_v0  ;;  %v366_v2 = vld [vmem:[%s1555_s1 + $0x10] sm:$0xff]  ;;  %v365_v3 = vld [vmem:[%s1555_s1 + $0x8] sm:$0xff]  ;;  %vm375_vm1 = vcmask 261120   ;;  %v364_v4 = vld [vmem:[%s1555_s1] sm:$0xff]  ;;  %v1276_v51 = vmov 1966171168  }
  0x2a   : > { %s354_s18 = scalar_select %p353_p12, %s1261_s12, 1  ;;  %1011 = vmatpush3.msra.mxu1 %v367_v1  ;;  %v956_v6 = vld [vmem:[%s1556_s2] ss:$0 sm:$0xff]  ;;  %v498_v10 = vld [vmem:[#allocation3 + $0x78] sm:$0xff]  ;;  %v497_v11 = vld [vmem:[#allocation3 + $0x70] sm:$0xff]  ;;  %v450_v14 = vand.u32 127, %v449_v13  ;;  %v577_v52 = vunpack.c.l.s4 %v1276_v51 }
  0x2b   : > { %1012 = vmatprep.subr.mxu1 %v1274_v0  ;;  %v496_v12 = vld [vmem:[#allocation3 + $0x68] sm:$0xff]  ;;  %v495_v20 = vld [vmem:[#allocation3 + $0x60] sm:$0xff]  ;;  %v494_v21 = vld [vmem:[#allocation3 + $0x58] sm:$0xff]  ;;  %v580_v54 = vshrl.u32 %v449_v13, 7  ;;  %vm835_vm3 = vcmask 130048   ;;  %s975_s27 = sshll.u32 %s1261_s12, 10 }
  0x2c   : > { %s955_s20 = sshll.u32 %s354_s18, 3  ;;  %1013 = vmatpush3.msra.mxu1 %v366_v2  ;;  %vm451_vm2 = vcmp.lt.s32.totalorder %v450_v14, 32  ;;  %v493_v22 = vld [vmem:[#allocation3 + $0x50] sm:$0xff]  ;;  %v492_v23 = vld [vmem:[#allocation3 + $0x48] sm:$0xff]  ;;  %v491_v24 = vld [vmem:[#allocation3 + $0x40] sm:$0xff]  ;;  %v578_v53 = vunpack.c.0.s8 %v577_v52  ;;  %s1501_s15 = scalar_lea.hbm %s1563_s9, %s975_s27 }
  0x2d   : > { %s356_s29 = scalar_lea.vmem %s1554_s0, %s955_s20  ;;  %1014 = vmatprep.subr.mxu1 %v1274_v0  ;;  %v490_v25 = vld [vmem:[#allocation3 + $0x38] sm:$0xff]  ;;  %v489_v26 = vld [vmem:[#allocation3 + $0x30] sm:$0xff]  ;;  %v488_v27 = vld [vmem:[#allocation3 + $0x28] sm:$0xff]  ;;  %v626_v57 = vsub.s32 0, %v580_v54  ;;  %s350_s20 = sand.u32 1, %s1253_s10  }
  0x2e   : > { %v363_v5 = vld [vmem:[%s356_s29] sm:$0xff]  ;;  %1015 = vmatpush3.msra.mxu1 %v365_v3  ;;  %v486_v29 = vld [vmem:[#allocation3 + $0x18] sm:$0xff]  ;;  %v485_v30 = vld [vmem:[#allocation3 + $0x10] sm:$0xff]  ;;  %v581_v55 = vsub.s32 %v578_v53, %v580_v54  ;;  %s954_s23 = sshll.u32 %s350_s20, 6  ;;  %s1509_s12 = scalar_lea.sflag [#allocation5], %s350_s20 }
  0x2f   : > { %1016 = vmatprep.subr.mxu1 %v1274_v0  ;;  %v487_v28 = vld [vmem:[#allocation3 + $0x20] sm:$0xff]  ;;  %v484_v31 = vld [vmem:[#allocation3 + $0x8] sm:$0xff]  ;;  %v1153_v33 = vld [vmem:[%s1561_s7 + $0x38] sm:$0xff]   ;;  %s352_s26 = scalar_lea.vmem [#allocation6], %s954_s23  ;;  %s1277_s18 = smov [#allocation6]  }
  0x30   : > { %1017 = vmatpush3.msra.mxu1 %v364_v4  ;;  %v483_v32 = vld [vmem:[#allocation3] sm:$0xff]  ;;  %v1154_v34 = vld [vmem:[%s1561_s7 + $0x30] sm:$0xff]   ;;  %1056 = vmatprep.subr.bf16.mxu0 %v1153_v33  ;;  %v1155_v35 = vld [vmem:[%s1561_s7 + $0x28] sm:$0xff]   ;;  %s860_s24 = sshll.u32 %s352_s26, 4  ;;  %s1193_s23 = sshll.u32 %s1277_s18, 4  ;;  %s1503_s24 = int_to_ptr.vmem [resolvable:$true] %s860_s24  ;;  %s1194_s23 = int_to_ptr.vmem [resolvable:$false] %s1193_s23 }
  0x31   : > { %1019 = vmatmul.mubr.msk.f32.vlgmr.msra.gmra.mxu1 %vm375_vm1, %v363_v5  ;;  %1021 = vmatprep.subr.mxu1 %v1274_v0  ;;  %v1156_v36 = vld [vmem:[%s1561_s7 + $0x20] sm:$0xff]   ;;  %v1157_v47 = vld [vmem:[%s1561_s7 + $0x18] sm:$0xff]   ;;  %v1158_v48 = vld [vmem:[%s1561_s7 + $0x10] sm:$0xff]   ;;  %s1189_s16 = scalar_lea.vmem %s1503_s24, 1024  ;;  %s1195_s5 = scalar_lea.vmem %s1194_s23, 2048 }
  0x32   : > { %1053 = vmatprep.mubr.msk.f32.mxu1 %vm1275_vm0, %v1274_v0  ;;  %1022 = vmatpush3.msra.mxu1 %v498_v10  ;;  %v958_v41 = vld [vmem:[%s1557_s3] ss:$0 sm:$0xff]  ;;  %v1159_v49 = vld [vmem:[%s1561_s7 + $0x8] sm:$0xff]   ;;  %p1190_p10 = scmp.ne.s32.totalorder %s1503_s24, %s1189_s16  ;;  %p1196_p0 = scmp.lt.s32.totalorder %s1503_s24, %s1194_s23 }
  0x33   : > { %1023 = vmatprep.subr.mxu1 %v1274_v0  ;;  %1057 = vmatpush3.bf16.msra.mxu0 %v1153_v33  ;;  %v959_v43 = vld [vmem:[%s1558_s4] ss:$0 sm:$0xff]  ;;  %p1197_p1 = scmp.lt.s32.totalorder %s1195_s5, %s1189_s16 }
  0x34   : > { %1024 = vmatpush3.msra.mxu1 %v497_v11  ;;  %1058 = vmatprep.subr.bf16.mxu0 %v1154_v34  ;;  %v1160_v50 = vld [vmem:[%s1561_s7] sm:$0xff]   ;;  %p1191_p11 = pnand %p1190_p10, %p1370_p4 }
  0x35   : > { %1025 = vmatprep.subr.mxu1 %v1274_v0  ;;  %v960_v4 = vld [vmem:[%s1560_s6] ss:$0 sm:$0xff]  ;;  %p1198_p2 = por %p1197_p1, %p1196_p0 }
  0x36   : > { %1026 = vmatpush3.msra.mxu1 %v496_v12  ;;  %p1192_p13 = pneg %p1191_p11 }
  0x37   : > { %1027 = vmatprep.subr.mxu1 %v1274_v0  ;;  %1059 = vmatpush3.bf16.msra.mxu0 %v1154_v34 }
  0x38   : > { %1028 = vmatpush3.msra.mxu1 %v495_v20  ;;  %1060 = vmatprep.subr.bf16.mxu0 %v1155_v35  ;;  %p1199_p3 = pnand %p1198_p2, %p1192_p13 }
  0x39   : > { %1029 = vmatprep.subr.mxu1 %v1274_v0 }
  0x3a   : > { %1030 = vmatpush3.msra.mxu1 %v494_v21 }
  0x3b   : > { %1031 = vmatprep.subr.mxu1 %v1274_v0  ;;  %1061 = vmatpush3.bf16.msra.mxu0 %v1155_v35 }
  0x3c   : > { %1032 = vmatpush3.msra.mxu1 %v493_v22  ;;  %1062 = vmatprep.subr.bf16.mxu0 %v1156_v36 }
  0x3d   : > { %1033 = vmatprep.subr.mxu1 %v1274_v0 }
  0x3e   : > { %1034 = vmatpush3.msra.mxu1 %v492_v23 }
  0x3f   : > { %1035 = vmatprep.subr.mxu1 %v1274_v0  ;;  %1063 = vmatpush3.bf16.msra.mxu0 %v1156_v36 }
  0x40   : > { %1036 = vmatpush3.msra.mxu1 %v491_v24  ;;  %1064 = vmatprep.subr.bf16.mxu0 %v1157_v47 }
  0x41   : > { %1037 = vmatprep.subr.mxu1 %v1274_v0 }
  0x42   : > { %1038 = vmatpush3.msra.mxu1 %v490_v25 }
  0x43   : > { %1039 = vmatprep.subr.mxu1 %v1274_v0  ;;  %1065 = vmatpush3.bf16.msra.mxu0 %v1157_v47 }
  0x44   : > { %1040 = vmatpush3.msra.mxu1 %v489_v26  ;;  %1066 = vmatprep.subr.bf16.mxu0 %v1158_v48 }
  0x45   : > { %1041 = vmatprep.subr.mxu1 %v1274_v0 }
  0x46   : > { %1042 = vmatpush3.msra.mxu1 %v488_v27 }
  0x47   : > { %1043 = vmatprep.subr.mxu1 %v1274_v0  ;;  %1067 = vmatpush3.bf16.msra.mxu0 %v1158_v48 }
  0x48   : > { %1044 = vmatpush3.msra.mxu1 %v487_v28  ;;  %1068 = vmatprep.subr.bf16.mxu0 %v1159_v49 }
  0x49   : > { %1045 = vmatprep.subr.mxu1 %v1274_v0 }
  0x4a   : > { %1046 = vmatpush3.msra.mxu1 %v486_v29 }
  0x4b   : > { %1047 = vmatprep.subr.mxu1 %v1274_v0  ;;  %1069 = vmatpush3.bf16.msra.mxu0 %v1159_v49 }
  0x4c   : > { %1048 = vmatpush3.msra.mxu1 %v485_v30  ;;  %1070 = vmatprep.subr.bf16.mxu0 %v1160_v50 }
  0x4d   : > { %1049 = vmatprep.subr.mxu1 %v1274_v0 }
  0x4e   : > { %1050 = vmatpush3.msra.mxu1 %v484_v31 }
  0x4f   : > { %1051 = vmatprep.subr.mxu1 %v1274_v0  ;;  %1071 = vmatpush3.bf16.msra.mxu0 %v1160_v50 }
  0x50   : > { %1052 = vmatpush3.msra.mxu1 %v483_v32 }
  0xf1   : > { %v445_v7 = vpop.f32.mrf.mxu1 }
  0xf2   : > { %v446_v8 = vadd.f32 %v956_v6, %v445_v7 }
  0xf3   : > { %v1020_v9 = vpop.f32.mrf.mxu1 }
  0xf4   : > { %452 = vadd.xlane.f32.xlu0 %v446_v8 }
 0x17d   : > { %v453_v15 = vpop.xlane.xlu0 %452 }
 0x17e   : > { %v454_v16 = vmul.f32 0.03125, %v453_v15 }
 0x180   : > { %v455_v17 = vsub.f32 %v446_v8, %v454_v16 }
 0x182   : > { %v458_v18 = vsel %vm451_vm2, %v455_v17, 0.0 }
 0x183   : > { %v459_v19 = vmul.f32 %v458_v18, %v458_v18 }
 0x185   : > { %460 = vadd.xlane.f32.xlu0 %v459_v19 }
 0x20e   : > { %v461_v37 = vpop.xlane.xlu0 %460 }
 0x20f   : > { %v462_v38 = vmul.f32 0.03125, %v461_v37 }
 0x211   : > { %v463_v39 = vadd.f32 1e-05, %v462_v38 }
 0x213   : > { %1161 = vrsqrt.f32 %v463_v39 }
 0x220   : > { %v1162_v40 = vpop.eup %1161 }
 0x221   : > { %v465_v42 = vmul.f32 %v1162_v40, %v458_v18 }
 0x223   : > { %v473_v44 = vmul.f32 %v958_v41, %v465_v42 }
 0x225   : > { %v481_v45 = vadd.f32 %v959_v43, %v473_v44 }
 0x227   : > { %v482_v46 = vmax.f32 %v481_v45, 0.0  ;;  %v961_v45 = vld [vmem:[%s1562_s8] ss:$0 sm:$0xff] }
 0x229   : > { %1054 = vmatmul.mubr.f32.vlgmr.msra.gmra.mxu1 %v482_v46 }
 0x2e9   : > { %v565_v56 = vpop.f32.mrf.mxu1 }
 0x2ea   : > { %v582_v58 = vrot.slane %v565_v56, %v581_v55  ;;  %v575_v59 = vcombine.high %v565_v56, %v565_v56 }
 0x2eb   : > { %v1055_v60 = vpop.f32.mrf.mxu1 }
 0x2ec   : > { %v590_v61 = vcombine.high %v582_v58, %v582_v58  ;;  %v598_v62 = vrot.slane %v582_v58, %v581_v55  ;;  %v589_v63 = vrot.slane %v575_v59, %v581_v55 }
 0x2ee   : > { %v612_v0 = vrot.slane %v590_v61, %v581_v55  ;;  %v620_v1 = vcombine.high %v598_v62, %v598_v62  ;;  %v627_v2 = vrot.slane %v598_v62, %v626_v57  ;;  %v591_v3 = vcombine.high %v589_v63, %v589_v63 }
 0x2ef   : > { %v605_v5 = vrot.slane %v589_v63, %v581_v55 }
 0x2f0   : > { %v622_v6 = vcombine.high %v612_v0, %v612_v0  ;;  %v631_v7 = vrot.slane %v612_v0, %v626_v57  ;;  %v664_v8 = vsub.f32 %v565_v56, %v627_v2  ;;  %v635_v9 = vrot.slane %v620_v1, %v626_v57 }
 0x2f1   : > { %v619_v10 = vrot.slane %v591_v3, %v581_v55  ;;  %v643_v11 = vrot.slane %v605_v5, %v626_v57  ;;  %v621_v12 = vcombine.high %v605_v5, %v605_v5 }
 0x2f2   : > { %v665_v13 = vsub.f32 %v565_v56, %v631_v7  ;;  %v679_v14 = vadd.f32 %v960_v4, %v664_v8  ;;  %v639_v15 = vrot.slane %v622_v6, %v626_v57  ;;  %v666_v16 = vsub.f32 %v565_v56, %v635_v9 }
 0x2f3   : > { %v647_v17 = vrot.slane %v619_v10, %v626_v57  ;;  %v668_v18 = vsub.f32 %v565_v56, %v643_v11  ;;  %v623_v19 = vcombine.high %v619_v10, %v619_v10  ;;  %v651_v23 = vrot.slane %v621_v12, %v626_v57 }
 0x2f4   : > { %v680_v20 = vadd.f32 %v960_v4, %v665_v13  ;;  %v667_v21 = vsub.f32 %v565_v56, %v639_v15  ;;  %v681_v22 = vadd.f32 %v960_v4, %v666_v16  ;;  %v687_v27 = vmax.f32 %v679_v14, 0.0 }
 0x2f5   : > { %v669_v24 = vsub.f32 %v565_v56, %v647_v17  ;;  %v683_v25 = vadd.f32 %v960_v4, %v668_v18  ;;  %v655_v26 = vrot.slane %v623_v19, %v626_v57  ;;  %v670_v35 = vsub.f32 %v565_v56, %v651_v23 }
 0x2f6   : > { %v688_v28 = vmax.f32 %v680_v20, 0.0  ;;  %v682_v29 = vadd.f32 %v960_v4, %v667_v21  ;;  %v689_v33 = vmax.f32 %v681_v22, 0.0 }
 0x2f7   : > { %v684_v30 = vadd.f32 %v960_v4, %v669_v24  ;;  %v671_v31 = vsub.f32 %v565_v56, %v655_v26  ;;  %v691_v36 = vmax.f32 %v683_v25, 0.0  ;;  %v685_v41 = vadd.f32 %v960_v4, %v670_v35 }
 0x2f8   : > { %v695_v32 = vpack.c.bf16 %v688_v28, %v687_v27  ;;  %v690_v34 = vmax.f32 %v682_v29, 0.0 }
 0x2f9   : > { %v692_v37 = vmax.f32 %v684_v30, 0.0  ;;  %v686_v39 = vadd.f32 %v960_v4, %v671_v31  ;;  %v693_v43 = vmax.f32 %v685_v41, 0.0 }
 0x2fa   : > { %1072 = vmatprep.mubr.bf16.mxu0 %v695_v32  ;;  %v696_v38 = vpack.c.bf16 %v690_v34, %v689_v33 }
 0x2fb   : > { %v697_v40 = vpack.c.bf16 %v692_v37, %v691_v36  ;;  %v694_v42 = vmax.f32 %v686_v39, 0.0 }
 0x2fc   : > { %1073 = vmatmul.mubr.bf16.vlgmr.msra.gmra.mxu0 %v696_v38 }
 0x2fd   : > { %1076 = vmatprep.mubr.bf16.mxu0 %v697_v40  ;;  %v698_v44 = vpack.c.bf16 %v694_v42, %v693_v43 }
 0x304   : > { %1077 = vmatmul.mubr.bf16.gmra.mxu0 %v698_v44 }
 0x3bc   : > { %v1074_v46 = vpop.f32.mrf.mxu0 }
 0x3bd   : > { %v813_v47 = vadd.f32 %v1074_v46, %v961_v45 }
 0x3be   : > { %v804_v48 = vpop.f32.mrf.mxu0 }
 0x3bf   : > { %838 = vst.msk [vmem:[%s352_s26 + $0x10] sm:$0xff] %vm835_vm3, %v813_v47  ;;  %v805_v49 = vadd.f32 %v961_v45, %v804_v48 }
 0x3c0   : > { %v1075_v50 = vpop.f32.mrf.mxu0 }
 0x3c1   : > { %836 = vst.msk [vmem:[%s352_s26] sm:$0xff] %vm835_vm3, %v805_v49  ;;  %v816_v51 = vadd.f32 %v1075_v50, %v961_v45 }
 0x3c2   : > { %v807_v52 = vpop.f32.mrf.mxu0 }
 0x3c3   : > { %839 = vst.msk [vmem:[%s352_s26 + $0x18] sm:$0xff] %vm835_vm3, %v816_v51  ;;  %v808_v53 = vadd.f32 %v961_v45, %v807_v52 }
 0x3c4   : > { %v1078_v54 = vpop.f32.mrf.mxu0 }
 0x3c5   : > { %837 = vst.msk [vmem:[%s352_s26 + $0x8] sm:$0xff] %vm835_vm3, %v808_v53  ;;  %v829_v55 = vadd.f32 %v1078_v54, %v961_v45 }
 0x3c6   : > { %v820_v56 = vpop.f32.mrf.mxu0 }
 0x3c7   : > { %842 = vst.msk [vmem:[%s352_s26 + $0x30] sm:$0xff] %vm835_vm3, %v829_v55  ;;  %v821_v57 = vadd.f32 %v961_v45, %v820_v56 }
 0x3c8   : > { %v1079_v58 = vpop.f32.mrf.mxu0 }
 0x3c9   : > { %840 = vst.msk [vmem:[%s352_s26 + $0x20] sm:$0xff] %vm835_vm3, %v821_v57  ;;  %v832_v59 = vadd.f32 %v1079_v58, %v961_v45 }
 0x3ca   : > { %v823_v60 = vpop.f32.mrf.mxu0 }
 0x3cb   : > { %843 = vst.msk [vmem:[%s352_s26 + $0x38] sm:$0xff] %vm835_vm3, %v832_v59  ;;  %v824_v61 = vadd.f32 %v961_v45, %v823_v60 }
 0x3cd   : > { %841 = vst.msk [vmem:[%s352_s26 + $0x28] sm:$0xff] %vm835_vm3, %v824_v61 }
 0x3ce   : > { %1202 = shalt.err (!%p1199_p3)
}
 0x3cf   : > { %s1203_s20 = scalar_lea.hbm %s1501_s15, 1024  ;;  %s1207_s27 = scalar_lea.hbm %s1563_s9, 2048 }
 0x3d0   : > { %p1204_p5 = scmp.ne.s32.totalorder %s1501_s15, %s1203_s20  ;;  %p1208_p9 = scmp.lt.s32.totalorder %s1501_s15, %s1563_s9 }
 0x3d1   : > { %p1209_p12 = scmp.lt.s32.totalorder %s1207_s27, %s1203_s20 }
 0x3d2   : > { %p1205_p6 = pnand %p1204_p5, %p1370_p4 }
 0x3d3   : > { %p1210_p10 = por %p1209_p12, %p1208_p9 }
 0x3d4   : > { %p1206_p7 = pneg %p1205_p6 }
 0x3d6   : > { %p1211_p11 = pnand %p1210_p10, %p1206_p7 }
 0x3d8   : > { %1214 = shalt.err (!%p1211_p11)
}
 0x3d9   : > { %s1278_s16 = smov 128   ;;  %s1279_s18 = smov 8  }
 0x3da   : > { %1084 = dma.vmem_to_hbm [thread:$0]  (%p1370_p4), %s1503_s24, 1024, %s1501_s15, %s1509_s12, %s1278_s16, %s1278_s16, %s1279_s18  }
 0x3db PF: > { %p1096_p13 = scmp.ge.s32.totalorder %s1269_s14, 2  ;;  %s875_s23 = sand.u32 1, %s1249_s30  }
 0x3dc   : > { %s876_s5 = scalar_lea.sflag [#allocation5], %s875_s23 }
 0x3dd   : > { %p1091_p0 = pnand %p1096_p13, %p1377_p8 }
 0x3df   : > { %p1092_p1 = pneg %p1091_p0 }
 0x3e1   : > { %1244 = dma.done.wait (%p1092_p1), %s876_s5, 1024  }
 0x3e2   : > { %1246 = vsyncadd (%p1092_p1), %s876_s5, 4294966272  ;;  %s23_s14 = sadd.s32 1, %s1269_s14   ;;  %s1570_s30 = smov %s1253_s10 }
 0x3e3   : > { %p20_p2 = scmp.ge.s32.totalorder %s23_s14, 4   ;;  %s1571_s10 = smov %s1257_s11 }
 0x3e4   : > { %s1572_s11 = smov %s1383_s22  ;;  %s1573_s12 = smov %s1265_s13 }
 0x3e5   : > { %s1574_s13 = smov %s1576_s17  ;;  %22 = sbr.rel (!%p20_p2) target bundleno = 7 (0x7), region = 101 }
 0x3ea   :  { %881 = vsyncpa [#allocation4], 1 }
 0x3eb   :  { %883 = vsyncpa [#allocation4 + $0x1], 1 }
 0x3ec   :  { %884 = vsyncpa [#allocation5], 1 }
 0x3ed   :  { %886 = vsyncpa [#allocation5 + $0x1], 1 }

</bundles_post_ra>
